<compile_context>
chip_gen: v6e
topology: v6e:2x2x1
jax: 0.10.0
libtpu: 0.0.40
codegen_flags: <defaults>
</compile_context>

<pallas_src>
import functools

import jax
import jax.numpy as jnp
import numpy as np
from jax.experimental import pallas as pl
from jax.experimental.pallas import tpu as pltpu

NEG_SLOPE = 0.01   # nn.LeakyReLU default
LN_EPS = 1e-5      # nn.LayerNorm default
GINE_EPS = 0.0     # GINEConv default eps (train_eps=False)

LANE = 128
NODE_ALIGN = 16    # bf16 sublane packing for the K=Np contraction


def _leaky_relu(v):
    return jnp.where(v >= 0, v, NEG_SLOPE * v)


def _round_up(v, m):
    return ((v + m - 1) // m) * m


def _pad_to(a, shape):
    return jnp.pad(a, [(0, s - d) for d, s in zip(a.shape, shape)])


def graph_encoder_kernel(
    # inputs
    x_ref, ea_ref, src_ref, tgt_ref,
    nw_ref, elw_ref, cnnw_ref, cnnb_ref,
    hw_ref, hb_ref, lng_ref, lnb_ref,
    row1_ref, row2_ref, rob_ref,
    # outputs
    x_out_ref, z_out_ref,
    # scratch
    x_scr, skip_scr, agg_scr,
    *, n_true, o_true,
):
    f32 = jnp.float32
    bf16 = jnp.bfloat16
    l = pl.program_id(0)              # conv layer
    t = pl.program_id(1)              # edge tile
    num_layers = pl.num_programs(0)
    num_tiles = pl.num_programs(1)
    np_pad = x_scr.shape[0]
    te = src_ref.shape[0]

    # ---- first grid step: node input projection. Bias is folded into the ones
    # column of x_ref, so padded node rows stay exactly zero.
    @pl.when((l == 0) & (t == 0))
    def _():
        x0 = jnp.dot(x_ref[...], nw_ref[...], preferred_element_type=f32)
        x_scr[...] = x0
        skip_scr[...] = x0

    # ---- start of each layer: accumulator starts at the GINEConv self term
    # (1+eps)*x, so the layer finalize is a single dot.
    @pl.when(t == 0)
    def _():
        agg_scr[...] = (1.0 + GINE_EPS) * x_scr[...]

    # ---- per edge-tile message passing (GINEConv message + sum aggregation).
    # e_lin = Lin_l(edge_layer(edge_attr)): both affines composed in the wrapper,
    # biases folded via the ones column of ea_ref (zero for padded edges).
    e_lin = jnp.dot(ea_ref[...], elw_ref[...], preferred_element_type=f32)        # [TE, H]

    # Build bf16 one-hot tiles in-registers from the int32 index blocks (padded
    # edges carry index -1 -> all-zero rows/cols). bf16 is exact for 0/1, so the
    # gather/scatter dots run at native bf16 MXU rate with f32 accumulation.
    src_oh = (jax.lax.broadcasted_iota(jnp.int32, (te, np_pad), 1)
              == src_ref[...]).astype(bf16)                                        # [TE, Np]
    x_j = jnp.dot(src_oh, x_scr[...].astype(bf16), preferred_element_type=f32)     # gather  [TE, H]
    msg = jnp.maximum(x_j + e_lin, 0.0)                                            # relu message (f32 VPU)
    tgt_oh = (jax.lax.broadcasted_iota(jnp.int32, (np_pad, te), 0)
              == tgt_ref[...]).astype(bf16)                                        # [Np, TE]
    agg_scr[...] += jnp.dot(tgt_oh, msg.astype(bf16), preferred_element_type=f32)  # scatter [Np, H]

    # ---- layer finalize: GINEConv nn = Linear + LeakyReLU (kept f32 for accuracy;
    # it is O(Np*H*H) per layer vs O(E*Np*H) per layer for the dots above).
    @pl.when(t == num_tiles - 1)
    def _():
        x_new = jnp.dot(agg_scr[...], cnnw_ref[...], preferred_element_type=f32) + cnnb_ref[...]
        x_scr[...] = _leaky_relu(x_new)

    # ---- whole-network finalize: skip, head (Linear + LayerNorm), gated readout.
    @pl.when((l == num_layers - 1) & (t == num_tiles - 1))
    def _():
        xf = skip_scr[...] + x_scr[...]                                            # [N, H]

        # head: Linear + LayerNorm over the *true* out_dim (padded lanes masked out).
        h = jnp.dot(xf, hw_ref[...], preferred_element_type=f32) + hb_ref[...]     # [N, O]
        lane_ids = jax.lax.broadcasted_iota(jnp.int32, h.shape, 1)
        mu = jnp.sum(h, axis=-1, keepdims=True) * (1.0 / o_true)
        cen = jnp.where(lane_ids < o_true, h - mu, 0.0)
        var = jnp.sum(cen * cen, axis=-1, keepdims=True) * (1.0 / o_true)
        x_out_ref[...] = cen * jax.lax.rsqrt(var + LN_EPS) * lng_ref[...] + lnb_ref[...]

        # graph readout: sum / mean over the true node rows only.
        row_ids = jax.lax.broadcasted_iota(jnp.int32, xf.shape, 0)
        xv = jnp.where(row_ids < n_true, xf, 0.0)
        z1 = jnp.sum(xv, axis=0, keepdims=True)                                    # [1, H] sum
        z2 = z1 * (1.0 / n_true)                                                   # [1, H] mean
        # gate||read weights fused: two dots instead of four M=1 dots.
        ro = (jnp.dot(z1, row1_ref[...], preferred_element_type=f32)
              + jnp.dot(z2, row2_ref[...], preferred_element_type=f32)
              + rob_ref[...])                                                      # [1, 2*O]
        o_pad = z_out_ref.shape[-1]
        z_out_ref[...] = ro[:, :o_pad] * ro[:, o_pad:]


def graph_encoder_forward(x, edge_attr, edge_index, params, *,
                          num_convs, hidden_dim, out_dim, edge_tile=512):
    """Single-graph (Data) forward of GraphEncoder as one tiled pallas_call."""
    assert num_convs >= 1
    assert edge_tile % LANE == 0
    f32 = jnp.float32
    n, dn = x.shape
    e, de = edge_attr.shape

    H = _round_up(hidden_dim, LANE)
    O = _round_up(out_dim, LANE)
    Np = _round_up(max(n, NODE_ALIGN), NODE_ALIGN)
    TE = edge_tile
    Ep = _round_up(max(e, TE), TE)
    n_tiles = Ep // TE

    # ---- index glue: int32 index blocks only (one-hot tiles are built in-kernel).
    # Padded edges use index -1 -> all-zero one-hot rows/cols (no contribution).
    src = edge_index[0].astype(jnp.int32)
    tgt = edge_index[1].astype(jnp.int32)
    fill = jnp.full((Ep - e,), -1, dtype=jnp.int32)
    src_col = jnp.concatenate([src, fill])[:, None]      # [Ep, 1]  (edge along sublanes)
    tgt_row = jnp.concatenate([tgt, fill])[None, :]      # [1, Ep]  (edge along lanes)

    # ---- inputs with an appended ones column: folds Linear biases and keeps
    # padded rows exactly zero.
    x_aug = _pad_to(jnp.concatenate([x.astype(f32), jnp.ones((n, 1), f32)], axis=1),
                    (Np, dn + 1))
    ea_aug = _pad_to(jnp.concatenate([edge_attr.astype(f32), jnp.ones((e, 1), f32)], axis=1),
                     (Ep, de + 1))

    # ---- weights: pre-transposed [in, out], zero-padded to the lane width.
    nw_aug = _pad_to(jnp.concatenate([params["node_w"], params["node_b"]], axis=0), (dn + 1, H))

    ew_aug = jnp.concatenate([params["edge_w"], params["edge_b"]], axis=0)   # [de+1, h]
    elw = []
    for l in range(num_convs):
        w = ew_aug @ params["conv_elin_w"][l]                    # compose edge_layer with conv edge-lin
        w = w.at[-1, :].add(params["conv_elin_b"][l][0])         # fold conv edge-lin bias into ones row
        elw.append(_pad_to(w, (de + 1, H)))
    elw = jnp.stack(elw)                                         # [L, de+1, H]

    cnnw = _pad_to(params["conv_nn_w"], (num_convs, H, H))       # [L, H, H]
    cnnb = _pad_to(params["conv_nn_b"], (num_convs, 1, H))       # [L, 1, H]

    hw = _pad_to(params["head_w"], (H, O))
    hb = _pad_to(params["head_b"], (1, O))
    lng = _pad_to(params["ln_g"], (1, O))
    lnb = _pad_to(params["ln_b"], (1, O))

    h_t = hidden_dim
    gw, rw = params["gate_w"], params["read_w"]                  # [2h, o]
    ro_w1 = jnp.concatenate([_pad_to(gw[:h_t], (H, O)), _pad_to(rw[:h_t], (H, O))], axis=1)  # [H, 2O]
    ro_w2 = jnp.concatenate([_pad_to(gw[h_t:], (H, O)), _pad_to(rw[h_t:], (H, O))], axis=1)  # [H, 2O]
    ro_b = jnp.concatenate([_pad_to(params["gate_b"], (1, O)),
                            _pad_to(params["read_b"], (1, O))], axis=1)                      # [1, 2O]

    kernel = functools.partial(graph_encoder_kernel, n_true=n, o_true=out_dim)

    def const(shape):
        return pl.BlockSpec(shape, lambda l, t, _n=len(shape): (0,) * _n)

    def per_layer(shape):
        return pl.BlockSpec((None,) + shape, lambda l, t: (l, 0, 0))

    in_specs = [
        const((Np, dn + 1)),                                     # x_aug
        pl.BlockSpec((TE, de + 1), lambda l, t: (t, 0)),         # edge_attr(+1) tile
        pl.BlockSpec((TE, 1), lambda l, t: (t, 0)),              # src index tile (gather one-hot)
        pl.BlockSpec((1, TE), lambda l, t: (0, t)),              # tgt index tile (scatter one-hot)
        const((dn + 1, H)),                                      # node_layer weight (+bias row)
        per_layer((de + 1, H)),                                  # composed edge affine of layer l
        per_layer((H, H)),                                       # conv nn weight of layer l
        per_layer((1, H)),                                       # conv nn bias of layer l
        const((H, O)), const((1, O)), const((1, O)), const((1, O)),   # head_w/b, ln_g/b
        const((H, 2 * O)), const((H, 2 * O)), const((1, 2 * O)),      # fused readout w1, w2, b
    ]
    out_specs = (
        pl.BlockSpec((Np, O), lambda l, t: (0, 0)),
        pl.BlockSpec((1, O), lambda l, t: (0, 0)),
    )
    scratch_shapes = [
        pltpu.VMEM((Np, H), f32),     # current node features
        pltpu.VMEM((Np, H), f32),     # skip connection
        pltpu.VMEM((Np, H), f32),     # per-layer edge aggregation accumulator
    ]

    # ---- VMEM budget (double-buffered per-step blocks + resident constants +
    # scratch + in-kernel temporaries), capped below physical VMEM with headroom.
    tile_bytes = 2 * (TE * (de + 1) * 4 + TE * 4 + TE * 4
                      + (de + 1) * H * 4 + H * H * 4 + H * 4)
    const_bytes = 2 * (Np * (dn + 1) * 4 + (dn + 1) * H * 4
                       + H * O * 4 + 3 * O * 4
                       + 2 * (H * 2 * O * 4) + 2 * O * 4
                       + Np * O * 4 + O * 4)
    scratch_bytes = 3 * Np * H * 4
    temp_bytes = (2 * TE * Np * 2          # bf16 one-hot tiles
                  + 2 * TE * Np * 4        # iota / compare intermediates
                  + 3 * TE * H * 4         # e_lin / x_j / msg (f32)
                  + TE * H * 2 + Np * H * 2)   # bf16 casts of msg / x_scr
    resident = tile_bytes + const_bytes + scratch_bytes + temp_bytes
    try:
        phys_vmem = int(pltpu.get_tpu_info().vmem_capacity_bytes)
    except Exception:
        phys_vmem = 64 * 1024 * 1024       # v7x per-TensorCore floor
    vmem_cap = (phys_vmem * 3) // 4        # headroom for compiler scratch
    vmem_limit = int(min(max(2 * resident, 32 * 1024 * 1024), vmem_cap))

    flops = (num_convs * (4 * Ep * Np * H + 2 * Ep * (de + 1) * H + 2 * Np * H * H)
             + 2 * (Np * (dn + 1) * H + Np * H * O + 2 * H * 2 * O))
    bytes_acc = (num_convs * (Ep * (de + 1) * 4 + 2 * Ep * 4
                              + (de + 1) * H * 4 + H * H * 4 + H * 4)
                 + Np * (dn + 1) * 4 + (dn + 1) * H * 4
                 + H * O * 4 + 3 * O * 4 + 2 * H * 2 * O * 4 + 2 * O * 4
                 + Np * O * 4 + O * 4)

    X_pad, Z_pad = pl.pallas_call(
        kernel,
        out_shape=(
            jax.ShapeDtypeStruct((Np, O), f32),
            jax.ShapeDtypeStruct((1, O), f32),
        ),
        grid_spec=pltpu.PrefetchScalarGridSpec(
            num_scalar_prefetch=0,
            grid=(num_convs, n_tiles),
            in_specs=in_specs,
            out_specs=out_specs,
            scratch_shapes=scratch_shapes,
        ),
        compiler_params=pltpu.CompilerParams(
            dimension_semantics=("arbitrary", "arbitrary"),   # serial layer dep + edge reduction
            vmem_limit_bytes=vmem_limit,
        ),
        cost_estimate=pl.CostEstimate(
            flops=int(flops), transcendentals=int(Np), bytes_accessed=int(bytes_acc)),
    )(
        x_aug, ea_aug, src_col, tgt_row,
        nw_aug, elw, cnnw, cnnb,
        hw, hb, lng, lnb,
        ro_w1, ro_w2, ro_b,
    )
    # Strip padding: true nodes / true feature lanes only.
    return X_pad[:n, :out_dim], Z_pad[:, :out_dim]


def graph_encoder_reference(x, edge_attr, edge_index, params, *, num_convs):
    """Pure-JAX reference mirroring the PyTorch forward (single-graph Data path)."""
    src, tgt = edge_index[0], edge_index[1]
    h = x @ params["node_w"] + params["node_b"]
    e = edge_attr @ params["edge_w"] + params["edge_b"]
    skip = h
    for l in range(num_convs):
        e_lin = e @ params["conv_elin_w"][l] + params["conv_elin_b"][l]
        msg = jnp.maximum(h[src] + e_lin, 0.0)
        agg = jnp.zeros_like(h).at[tgt].add(msg)
        out = agg + (1.0 + GINE_EPS) * h
        h = _leaky_relu(out @ params["conv_nn_w"][l] + params["conv_nn_b"][l])
    h = skip + h
    hd = h @ params["head_w"] + params["head_b"]
    mu = jnp.mean(hd, axis=-1, keepdims=True)
    var = jnp.mean((hd - mu) ** 2, axis=-1, keepdims=True)
    X = (hd - mu) / jnp.sqrt(var + LN_EPS) * params["ln_g"] + params["ln_b"]
    Z1 = h.sum(0, keepdims=True)
    Z2 = h.mean(0, keepdims=True)
    Zc = jnp.concatenate([Z1, Z2], axis=-1)
    Z = (Zc @ params["gate_w"] + params["gate_b"]) * (Zc @ params["read_w"] + params["read_b"])
    return X, Z


def make_params(key, *, input_node_dim, input_edge_dim, hidden_dim, out_dim, num_convs):
    """Deterministic synthetic init (kaiming-ish normals, transposed to [in, out])."""
    keys = iter(jax.random.split(key, 32))

    def lin(in_d, out_d):
        std = float(np.sqrt(2.0 / in_d))
        w = jax.random.normal(next(keys), (in_d, out_d), jnp.float32) * std
        b = jax.random.normal(next(keys), (1, out_d), jnp.float32) * 0.01
        return w, b

    nw, nb = lin(input_node_dim, hidden_dim)
    ew, eb = lin(input_edge_dim, hidden_dim)
    celw, celb, cnnw, cnnb = [], [], [], []
    for _ in range(num_convs):
        w1, b1 = lin(hidden_dim, hidden_dim)   # GINEConv internal edge lin
        w2, b2 = lin(hidden_dim, hidden_dim)   # GINEConv nn: Linear(H, H)
        celw.append(w1); celb.append(b1); cnnw.append(w2); cnnb.append(b2)
    hw, hb = lin(hidden_dim, out_dim)
    gw, gb = lin(2 * hidden_dim, out_dim)
    rw, rb = lin(2 * hidden_dim, out_dim)
    return {
        "node_w": nw, "node_b": nb,
        "edge_w": ew, "edge_b": eb,
        "conv_elin_w": jnp.stack(celw), "conv_elin_b": jnp.stack(celb),
        "conv_nn_w": jnp.stack(cnnw), "conv_nn_b": jnp.stack(cnnb),
        "head_w": hw, "head_b": hb,
        "ln_g": jnp.ones((1, out_dim), jnp.float32),
        "ln_b": jnp.zeros((1, out_dim), jnp.float32),
        "gate_w": gw, "gate_b": gb,
        "read_w": rw, "read_b": rb,
    }


if __name__ == "__main__":
    # Small shapes consistent with the module's forward (single-graph Data path).
    # Edge count > edge_tile so the multi-tile accumulation path is exercised.
    N_NODES, N_EDGES = 16, 160
    INPUT_NODE_DIM, INPUT_EDGE_DIM = 8, 4
    HIDDEN_DIM, OUT_DIM, NUM_CONVS = 32, 16, 2

    key = jax.random.PRNGKey(0)
    k_x, k_e, k_src, k_tgt, k_p = jax.random.split(key, 5)

    x = jax.random.normal(k_x, (N_NODES, INPUT_NODE_DIM), jnp.float32)
    edge_attr = jax.random.normal(k_e, (N_EDGES, INPUT_EDGE_DIM), jnp.float32)
    edge_index = jnp.stack([
        jax.random.randint(k_src, (N_EDGES,), 0, N_NODES),
        jax.random.randint(k_tgt, (N_EDGES,), 0, N_NODES),
    ]).astype(jnp.int32)                                   # [2, E]

    params = make_params(
        k_p,
        input_node_dim=INPUT_NODE_DIM, input_edge_dim=INPUT_EDGE_DIM,
        hidden_dim=HIDDEN_DIM, out_dim=OUT_DIM, num_convs=NUM_CONVS,
    )

    X, Z = graph_encoder_forward(
        x, edge_attr, edge_index, params,
        num_convs=NUM_CONVS, hidden_dim=HIDDEN_DIM, out_dim=OUT_DIM,
        edge_tile=128,   # small tile here to cover the multi-tile reduction path
    )
    jax.block_until_ready((X, Z))

    X_ref, Z_ref = graph_encoder_reference(
        x, edge_attr, edge_index, params, num_convs=NUM_CONVS,
    )
    # bf16 MXU operands (f32 accumulate) on the gather/scatter dots -> tolerance
    # sized for ~bf16 relative error; wiring bugs would be orders of magnitude off.
    np.testing.assert_allclose(np.asarray(X), np.asarray(X_ref), rtol=2e-2, atol=2e-2)
    np.testing.assert_allclose(np.asarray(Z), np.asarray(Z_ref), rtol=2e-2, atol=2e-2)

    assert X.shape == (N_NODES, OUT_DIM) and Z.shape == (1, OUT_DIM)
    # TODO(synk): PyG Batch path (scatter_sum/scatter_mean over data.batch) not implemented;
    # only the single-graph Data readout is covered. A batched path would add a leading
    # "parallel" grid axis (useful for the second TensorCore on v7x).
    print("KERNEL_OK")
</pallas_src>

<mosaic_0001>
module attributes {stable_mosaic.version = 11 : i64} {
  func.func @graph_encoder_kernel(%arg0: i32, %arg1: i32, %arg2: memref<16x9xf32, #tpu.memory_space<vmem>>, %arg3: memref<128x5xf32, #tpu.memory_space<vmem>>, %arg4: memref<128x1xi32, #tpu.memory_space<vmem>>, %arg5: memref<1x128xi32, #tpu.memory_space<vmem>>, %arg6: memref<9x128xf32, #tpu.memory_space<vmem>>, %arg7: memref<1x5x128xf32, #tpu.memory_space<vmem>>, %arg8: memref<1x128x128xf32, #tpu.memory_space<vmem>>, %arg9: memref<1x1x128xf32, #tpu.memory_space<vmem>>, %arg10: memref<128x128xf32, #tpu.memory_space<vmem>>, %arg11: memref<1x128xf32, #tpu.memory_space<vmem>>, %arg12: memref<1x128xf32, #tpu.memory_space<vmem>>, %arg13: memref<1x128xf32, #tpu.memory_space<vmem>>, %arg14: memref<128x256xf32, #tpu.memory_space<vmem>>, %arg15: memref<128x256xf32, #tpu.memory_space<vmem>>, %arg16: memref<1x256xf32, #tpu.memory_space<vmem>>, %arg17: memref<16x128xf32, #tpu.memory_space<vmem>>, %arg18: memref<1x128xf32, #tpu.memory_space<vmem>>, %arg19: memref<16x128xf32, #tpu.memory_space<vmem>>, %arg20: memref<16x128xf32, #tpu.memory_space<vmem>>, %arg21: memref<16x128xf32, #tpu.memory_space<vmem>>) attributes {dimension_semantics = [#tpu.dimension_semantics<arbitrary>, #tpu.dimension_semantics<arbitrary>], iteration_bounds = array<i64: 2, 2>, scalar_prefetch = 0 : i64, scratch_operands = 3 : i64, tpu.core_type = #tpu.core_type<tc>, window_params = [{pipeline_mode = #tpu.pipeline_mode<synchronous>, transform_indices = @transform_0, window_bounds = array<i64: 16, 9>}, {transform_indices = @transform_1, window_bounds = array<i64: 128, 5>}, {transform_indices = @transform_2, window_bounds = array<i64: 128, 1>}, {transform_indices = @transform_3, window_bounds = array<i64: 1, 128>}, {pipeline_mode = #tpu.pipeline_mode<synchronous>, transform_indices = @transform_4, window_bounds = array<i64: 9, 128>}, {transform_indices = @transform_5, window_bounds = array<i64: 1, 5, 128>}, {transform_indices = @transform_6, window_bounds = array<i64: 1, 128, 128>}, {transform_indices = @transform_7, window_bounds = array<i64: 1, 1, 128>}, {pipeline_mode = #tpu.pipeline_mode<synchronous>, transform_indices = @transform_8, window_bounds = array<i64: 128, 128>}, {pipeline_mode = #tpu.pipeline_mode<synchronous>, transform_indices = @transform_9, window_bounds = array<i64: 1, 128>}, {pipeline_mode = #tpu.pipeline_mode<synchronous>, transform_indices = @transform_10, window_bounds = array<i64: 1, 128>}, {pipeline_mode = #tpu.pipeline_mode<synchronous>, transform_indices = @transform_11, window_bounds = array<i64: 1, 128>}, {pipeline_mode = #tpu.pipeline_mode<synchronous>, transform_indices = @transform_12, window_bounds = array<i64: 128, 256>}, {pipeline_mode = #tpu.pipeline_mode<synchronous>, transform_indices = @transform_13, window_bounds = array<i64: 128, 256>}, {pipeline_mode = #tpu.pipeline_mode<synchronous>, transform_indices = @transform_14, window_bounds = array<i64: 1, 256>}, {pipeline_mode = #tpu.pipeline_mode<synchronous>, transform_indices = @transform_15, window_bounds = array<i64: 16, 128>}, {pipeline_mode = #tpu.pipeline_mode<synchronous>, transform_indices = @transform_16, window_bounds = array<i64: 1, 128>}]} {
    %c0_i32 = arith.constant 0 : i32
    %0 = arith.cmpi eq, %arg0, %c0_i32 : i32
    %c0_i32_0 = arith.constant 0 : i32
    %1 = arith.cmpi eq, %arg1, %c0_i32_0 : i32
    %2 = arith.andi %0, %1 : i1
    %3 = arith.extui %2 : i1 to i32
    %c0_i32_1 = arith.constant 0 : i32
    %4 = arith.cmpi ne, %3, %c0_i32_1 : i32
    scf.if %4 {
      %c0_25 = arith.constant 0 : index
      %c0_26 = arith.constant 0 : index
      %45 = vector.load %arg2[%c0_25, %c0_26] : memref<16x9xf32, #tpu.memory_space<vmem>>, vector<16x9xf32>
      %c0_27 = arith.constant 0 : index
      %c0_28 = arith.constant 0 : index
      %46 = vector.load %arg6[%c0_27, %c0_28] : memref<9x128xf32, #tpu.memory_space<vmem>>, vector<9x128xf32>
      %cst_29 = arith.constant dense<0.000000e+00> : vector<16x128xf32>
      %47 = tpu.matmul %45, %46, %cst_29 {dimension_numbers = #tpu.dot_dimension_numbers<[1], [0], [0], [1], [0, 0, 1, 1], [], []>} : vector<16x9xf32>, vector<9x128xf32>, vector<16x128xf32> -> vector<16x128xf32>
      %c0_30 = arith.constant 0 : index
      %c0_31 = arith.constant 0 : index
      %48 = vector.load %arg19[%c0_30, %c0_31] : memref<16x128xf32, #tpu.memory_space<vmem>>, vector<16x128xf32>
      tpu.vector_store %arg19[%c0_30, %c0_31], %47 {strides = array<i32>} : memref<16x128xf32, #tpu.memory_space<vmem>>, vector<16x128xf32>,
      %c0_32 = arith.constant 0 : index
      %c0_33 = arith.constant 0 : index
      %49 = vector.load %arg20[%c0_32, %c0_33] : memref<16x128xf32, #tpu.memory_space<vmem>>, vector<16x128xf32>
      tpu.vector_store %arg20[%c0_32, %c0_33], %47 {strides = array<i32>} : memref<16x128xf32, #tpu.memory_space<vmem>>, vector<16x128xf32>,
    } else {
    }
    %c0_i32_2 = arith.constant 0 : i32
    %5 = arith.cmpi eq, %arg1, %c0_i32_2 : i32
    %6 = arith.extui %5 : i1 to i32
    %c0_i32_3 = arith.constant 0 : i32
    %7 = arith.cmpi ne, %6, %c0_i32_3 : i32
    scf.if %7 {
      %c0_25 = arith.constant 0 : index
      %c0_26 = arith.constant 0 : index
      %45 = vector.load %arg19[%c0_25, %c0_26] : memref<16x128xf32, #tpu.memory_space<vmem>>, vector<16x128xf32>
      %cst_27 = arith.constant 1.000000e+00 : f32
      %46 = vector.broadcast %cst_27 : f32 to vector<16x128xf32>
      %47 = arith.mulf %46, %45 : vector<16x128xf32>
      %c0_28 = arith.constant 0 : index
      %c0_29 = arith.constant 0 : index
      %48 = vector.load %arg21[%c0_28, %c0_29] : memref<16x128xf32, #tpu.memory_space<vmem>>, vector<16x128xf32>
      tpu.vector_store %arg21[%c0_28, %c0_29], %47 {strides = array<i32>} : memref<16x128xf32, #tpu.memory_space<vmem>>, vector<16x128xf32>,
    } else {
    }
    %c0 = arith.constant 0 : index
    %c0_4 = arith.constant 0 : index
    %8 = vector.load %arg3[%c0, %c0_4] : memref<128x5xf32, #tpu.memory_space<vmem>>, vector<128x5xf32>
    %c0_5 = arith.constant 0 : index
    %c0_6 = arith.constant 0 : index
    %c0_7 = arith.constant 0 : index
    %9 = vector.load %arg7[%c0_5, %c0_6, %c0_7] : memref<1x5x128xf32, #tpu.memory_space<vmem>>, vector<1x5x128xf32>
    %10 = vector.shape_cast %9 : vector<1x5x128xf32> to vector<5x128xf32>
    %cst = arith.constant dense<0.000000e+00> : vector<128x128xf32>
    %11 = tpu.matmul %8, %10, %cst {dimension_numbers = #tpu.dot_dimension_numbers<[1], [0], [0], [1], [0, 0, 1, 1], [], []>} : vector<128x5xf32>, vector<5x128xf32>, vector<128x128xf32> -> vector<128x128xf32>
    %12 = tpu.iota {dimensions = array<i32: 1>} : vector<128x16xi32>
    %c0_8 = arith.constant 0 : index
    %c0_9 = arith.constant 0 : index
    %13 = vector.load %arg4[%c0_8, %c0_9] : memref<128x1xi32, #tpu.memory_space<vmem>>, vector<128x1xi32>
    %14 = vector.broadcast %13 : vector<128x1xi32> to vector<128x16xi32>
    %15 = arith.cmpi eq, %12, %14 : vector<128x16xi32>
    %16 = arith.extui %15 : vector<128x16xi1> to vector<128x16xi32>
    %17 = arith.sitofp %16 : vector<128x16xi32> to vector<128x16xf32>
    %18 = arith.truncf %17 : vector<128x16xf32> to vector<128x16xbf16>
    %c0_10 = arith.constant 0 : index
    %c0_11 = arith.constant 0 : index
    %19 = vector.load %arg19[%c0_10, %c0_11] : memref<16x128xf32, #tpu.memory_space<vmem>>, vector<16x128xf32>
    %20 = arith.truncf %19 : vector<16x128xf32> to vector<16x128xbf16>
    %cst_12 = arith.constant dense<0.000000e+00> : vector<128x128xf32>
    %21 = tpu.matmul %18, %20, %cst_12 {dimension_numbers = #tpu.dot_dimension_numbers<[1], [0], [0], [1], [0, 0, 1, 1], [], []>} : vector<128x16xbf16>, vector<16x128xbf16>, vector<128x128xf32> -> vector<128x128xf32>
    %22 = arith.addf %21, %11 : vector<128x128xf32>
    %cst_13 = arith.constant 0.000000e+00 : f32
    %23 = vector.broadcast %cst_13 : f32 to vector<128x128xf32>
    %24 = arith.maximumf %22, %23 : vector<128x128xf32>
    %25 = tpu.iota {dimensions = array<i32: 0>} : vector<16x128xi32>
    %c0_14 = arith.constant 0 : index
    %c0_15 = arith.constant 0 : index
    %26 = vector.load %arg5[%c0_14, %c0_15] : memref<1x128xi32, #tpu.memory_space<vmem>>, vector<1x128xi32>
    %27 = vector.broadcast %26 : vector<1x128xi32> to vector<16x128xi32>
    %28 = arith.cmpi eq, %25, %27 : vector<16x128xi32>
    %29 = arith.extui %28 : vector<16x128xi1> to vector<16x128xi32>
    %30 = arith.sitofp %29 : vector<16x128xi32> to vector<16x128xf32>
    %31 = arith.truncf %30 : vector<16x128xf32> to vector<16x128xbf16>
    %c0_16 = arith.constant 0 : index
    %c0_17 = arith.constant 0 : index
    %32 = vector.load %arg21[%c0_16, %c0_17] : memref<16x128xf32, #tpu.memory_space<vmem>>, vector<16x128xf32>
    %33 = arith.truncf %24 : vector<128x128xf32> to vector<128x128xbf16>
    %cst_18 = arith.constant dense<0.000000e+00> : vector<16x128xf32>
    %34 = tpu.matmul %31, %33, %cst_18 {dimension_numbers = #tpu.dot_dimension_numbers<[1], [0], [0], [1], [0, 0, 1, 1], [], []>} : vector<16x128xbf16>, vector<128x128xbf16>, vector<16x128xf32> -> vector<16x128xf32>
    %35 = arith.addf %32, %34 : vector<16x128xf32>
    %c0_19 = arith.constant 0 : index
    %c0_20 = arith.constant 0 : index
    %36 = vector.load %arg21[%c0_19, %c0_20] : memref<16x128xf32, #tpu.memory_space<vmem>>, vector<16x128xf32>
    tpu.vector_store %arg21[%c0_19, %c0_20], %35 {strides = array<i32>} : memref<16x128xf32, #tpu.memory_space<vmem>>, vector<16x128xf32>,
    %c1_i32 = arith.constant 1 : i32
    %37 = arith.cmpi eq, %arg1, %c1_i32 : i32
    %38 = arith.extui %37 : i1 to i32
    %c0_i32_21 = arith.constant 0 : i32
    %39 = arith.cmpi ne, %38, %c0_i32_21 : i32
    scf.if %39 {
      %c0_25 = arith.constant 0 : index
      %c0_26 = arith.constant 0 : index
      %45 = vector.load %arg21[%c0_25, %c0_26] : memref<16x128xf32, #tpu.memory_space<vmem>>, vector<16x128xf32>
      %c0_27 = arith.constant 0 : index
      %c0_28 = arith.constant 0 : index
      %c0_29 = arith.constant 0 : index
      %46 = vector.load %arg8[%c0_27, %c0_28, %c0_29] : memref<1x128x128xf32, #tpu.memory_space<vmem>>, vector<1x128x128xf32>
      %47 = vector.shape_cast %46 : vector<1x128x128xf32> to vector<128x128xf32>
      %cst_30 = arith.constant dense<0.000000e+00> : vector<16x128xf32>
      %48 = tpu.matmul %45, %47, %cst_30 {dimension_numbers = #tpu.dot_dimension_numbers<[1], [0], [0], [1], [0, 0, 1, 1], [], []>} : vector<16x128xf32>, vector<128x128xf32>, vector<16x128xf32> -> vector<16x128xf32>
      %c0_31 = arith.constant 0 : index
      %c0_32 = arith.constant 0 : index
      %c0_33 = arith.constant 0 : index
      %49 = vector.load %arg9[%c0_31, %c0_32, %c0_33] : memref<1x1x128xf32, #tpu.memory_space<vmem>>, vector<1x1x128xf32>
      %50 = vector.shape_cast %49 : vector<1x1x128xf32> to vector<1x128xf32>
      %51 = vector.broadcast %50 : vector<1x128xf32> to vector<16x128xf32>
      %52 = arith.addf %48, %51 : vector<16x128xf32>
      %cst_34 = arith.constant 0.000000e+00 : f32
      %53 = vector.broadcast %cst_34 : f32 to vector<16x128xf32>
      %54 = arith.cmpf oge, %52, %53 : vector<16x128xf32>
      %cst_35 = arith.constant 0.00999999977 : f32
      %55 = vector.broadcast %cst_35 : f32 to vector<16x128xf32>
      %56 = arith.mulf %55, %52 : vector<16x128xf32>
      %57 = arith.select %54, %52, %56 : vector<16x128xi1>, vector<16x128xf32>
      %c0_36 = arith.constant 0 : index
      %c0_37 = arith.constant 0 : index
      %58 = vector.load %arg19[%c0_36, %c0_37] : memref<16x128xf32, #tpu.memory_space<vmem>>, vector<16x128xf32>
      tpu.vector_store %arg19[%c0_36, %c0_37], %57 {strides = array<i32>} : memref<16x128xf32, #tpu.memory_space<vmem>>, vector<16x128xf32>,
    } else {
    }
    %c1_i32_22 = arith.constant 1 : i32
    %40 = arith.cmpi eq, %arg0, %c1_i32_22 : i32
    %c1_i32_23 = arith.constant 1 : i32
    %41 = arith.cmpi eq, %arg1, %c1_i32_23 : i32
    %42 = arith.andi %40, %41 : i1
    %43 = arith.extui %42 : i1 to i32
    %c0_i32_24 = arith.constant 0 : i32
    %44 = arith.cmpi ne, %43, %c0_i32_24 : i32
    scf.if %44 {
      %c0_25 = arith.constant 0 : index
      %c0_26 = arith.constant 0 : index
      %45 = vector.load %arg20[%c0_25, %c0_26] : memref<16x128xf32, #tpu.memory_space<vmem>>, vector<16x128xf32>
      %c0_27 = arith.constant 0 : index
      %c0_28 = arith.constant 0 : index
      %46 = vector.load %arg19[%c0_27, %c0_28] : memref<16x128xf32, #tpu.memory_space<vmem>>, vector<16x128xf32>
      %47 = arith.addf %45, %46 : vector<16x128xf32>
      %c0_29 = arith.constant 0 : index
      %c0_30 = arith.constant 0 : index
      %48 = vector.load %arg10[%c0_29, %c0_30] : memref<128x128xf32, #tpu.memory_space<vmem>>, vector<128x128xf32>
      %cst_31 = arith.constant dense<0.000000e+00> : vector<16x128xf32>
      %49 = tpu.matmul %47, %48, %cst_31 {dimension_numbers = #tpu.dot_dimension_numbers<[1], [0], [0], [1], [0, 0, 1, 1], [], []>} : vector<16x128xf32>, vector<128x128xf32>, vector<16x128xf32> -> vector<16x128xf32>
      %c0_32 = arith.constant 0 : index
      %c0_33 = arith.constant 0 : index
      %50 = vector.load %arg11[%c0_32, %c0_33] : memref<1x128xf32, #tpu.memory_space<vmem>>, vector<1x128xf32>
      %51 = vector.broadcast %50 : vector<1x128xf32> to vector<16x128xf32>
      %52 = arith.addf %49, %51 : vector<16x128xf32>
      %53 = tpu.iota {dimensions = array<i32: 1>} : vector<16x128xi32>
      %cst_34 = arith.constant dense<0.000000e+00> : vector<16xf32>
      %54 = vector.multi_reduction <add>, %52, %cst_34 [1] : vector<16x128xf32> to vector<16xf32>
      %55 = vector.shape_cast %54 : vector<16xf32> to vector<16x1xf32>
      %cst_35 = arith.constant 6.250000e-02 : f32
      %56 = vector.broadcast %cst_35 : f32 to vector<16x1xf32>
      %57 = arith.mulf %55, %56 : vector<16x1xf32>
      %c16_i32 = arith.constant 16 : i32
      %58 = vector.broadcast %c16_i32 : i32 to vector<16x128xi32>
      %59 = arith.cmpi slt, %53, %58 : vector<16x128xi32>
      %60 = vector.broadcast %57 : vector<16x1xf32> to vector<16x128xf32>
      %61 = arith.subf %52, %60 : vector<16x128xf32>
      %cst_36 = arith.constant 0.000000e+00 : f32
      %62 = vector.broadcast %cst_36 : f32 to vector<16x128xf32>
      %63 = arith.select %59, %61, %62 : vector<16x128xi1>, vector<16x128xf32>
      %64 = arith.mulf %63, %63 : vector<16x128xf32>
      %cst_37 = arith.constant dense<0.000000e+00> : vector<16xf32>
      %65 = vector.multi_reduction <add>, %64, %cst_37 [1] : vector<16x128xf32> to vector<16xf32>
      %66 = vector.shape_cast %65 : vector<16xf32> to vector<16x1xf32>
      %cst_38 = arith.constant 6.250000e-02 : f32
      %67 = vector.broadcast %cst_38 : f32 to vector<16x1xf32>
      %68 = arith.mulf %66, %67 : vector<16x1xf32>
      %cst_39 = arith.constant 9.99999974E-6 : f32
      %69 = vector.broadcast %cst_39 : f32 to vector<16x1xf32>
      %70 = arith.addf %68, %69 : vector<16x1xf32>
      %71 = math.rsqrt %70 : vector<16x1xf32>
      %72 = vector.broadcast %71 : vector<16x1xf32> to vector<16x128xf32>
      %73 = arith.mulf %63, %72 : vector<16x128xf32>
      %c0_40 = arith.constant 0 : index
      %c0_41 = arith.constant 0 : index
      %74 = vector.load %arg12[%c0_40, %c0_41] : memref<1x128xf32, #tpu.memory_space<vmem>>, vector<1x128xf32>
      %75 = vector.broadcast %74 : vector<1x128xf32> to vector<16x128xf32>
      %76 = arith.mulf %73, %75 : vector<16x128xf32>
      %c0_42 = arith.constant 0 : index
      %c0_43 = arith.constant 0 : index
      %77 = vector.load %arg13[%c0_42, %c0_43] : memref<1x128xf32, #tpu.memory_space<vmem>>, vector<1x128xf32>
      %78 = vector.broadcast %77 : vector<1x128xf32> to vector<16x128xf32>
      %79 = arith.addf %76, %78 : vector<16x128xf32>
      %c0_44 = arith.constant 0 : index
      %c0_45 = arith.constant 0 : index
      %80 = vector.load %arg17[%c0_44, %c0_45] : memref<16x128xf32, #tpu.memory_space<vmem>>, vector<16x128xf32>
      tpu.vector_store %arg17[%c0_44, %c0_45], %79 {strides = array<i32>} : memref<16x128xf32, #tpu.memory_space<vmem>>, vector<16x128xf32>,
      %81 = tpu.iota {dimensions = array<i32: 0>} : vector<16x128xi32>
      %c16_i32_46 = arith.constant 16 : i32
      %82 = vector.broadcast %c16_i32_46 : i32 to vector<16x128xi32>
      %83 = arith.cmpi slt, %81, %82 : vector<16x128xi32>
      %cst_47 = arith.constant 0.000000e+00 : f32
      %84 = vector.broadcast %cst_47 : f32 to vector<16x128xf32>
      %85 = arith.select %83, %47, %84 : vector<16x128xi1>, vector<16x128xf32>
      %cst_48 = arith.constant dense<0.000000e+00> : vector<128xf32>
      %86 = vector.multi_reduction <add>, %85, %cst_48 [0] : vector<16x128xf32> to vector<128xf32>
      %87 = vector.shape_cast %86 : vector<128xf32> to vector<1x128xf32>
      %cst_49 = arith.constant 6.250000e-02 : f32
      %88 = vector.broadcast %cst_49 : f32 to vector<1x128xf32>
      %89 = arith.mulf %87, %88 : vector<1x128xf32>
      %c0_50 = arith.constant 0 : index
      %c0_51 = arith.constant 0 : index
      %90 = vector.load %arg14[%c0_50, %c0_51] : memref<128x256xf32, #tpu.memory_space<vmem>>, vector<128x256xf32>
      %cst_52 = arith.constant dense<0.000000e+00> : vector<1x256xf32>
      %91 = tpu.matmul %87, %90, %cst_52 {dimension_numbers = #tpu.dot_dimension_numbers<[1], [0], [0], [1], [0, 0, 1, 1], [], []>} : vector<1x128xf32>, vector<128x256xf32>, vector<1x256xf32> -> vector<1x256xf32>
      %c0_53 = arith.constant 0 : index
      %c0_54 = arith.constant 0 : index
      %92 = vector.load %arg15[%c0_53, %c0_54] : memref<128x256xf32, #tpu.memory_space<vmem>>, vector<128x256xf32>
      %cst_55 = arith.constant dense<0.000000e+00> : vector<1x256xf32>
      %93 = tpu.matmul %89, %92, %cst_55 {dimension_numbers = #tpu.dot_dimension_numbers<[1], [0], [0], [1], [0, 0, 1, 1], [], []>} : vector<1x128xf32>, vector<128x256xf32>, vector<1x256xf32> -> vector<1x256xf32>
      %94 = arith.addf %91, %93 : vector<1x256xf32>
      %c0_56 = arith.constant 0 : index
      %c0_57 = arith.constant 0 : index
      %95 = vector.load %arg16[%c0_56, %c0_57] : memref<1x256xf32, #tpu.memory_space<vmem>>, vector<1x256xf32>
      %96 = arith.addf %94, %95 : vector<1x256xf32>
      %97 = vector.extract_strided_slice %96 {offsets = [0, 0], sizes = [1, 128], strides = [1, 1]} : vector<1x256xf32> to vector<1x128xf32>
      %98 = vector.extract_strided_slice %96 {offsets = [0, 128], sizes = [1, 128], strides = [1, 1]} : vector<1x256xf32> to vector<1x128xf32>
      %99 = arith.mulf %97, %98 : vector<1x128xf32>
      %c0_58 = arith.constant 0 : index
      %c0_59 = arith.constant 0 : index
      %100 = vector.load %arg18[%c0_58, %c0_59] : memref<1x128xf32, #tpu.memory_space<vmem>>, vector<1x128xf32>
      tpu.vector_store %arg18[%c0_58, %c0_59], %99 {strides = array<i32>} : memref<1x128xf32, #tpu.memory_space<vmem>>, vector<1x128xf32>,
    } else {
    }
    return
  }
  func.func @transform_0(%arg0: i32, %arg1: i32) -> (i32, i32) {
    %c0_i32 = arith.constant 0 : i32
    %c0_i32_0 = arith.constant 0 : i32
    %c0_i32_1 = arith.constant 0 : i32
    return %c0_i32, %c0_i32_0 : i32, i32
  }
  func.func @transform_1(%arg0: i32, %arg1: i32) -> (i32, i32) {
    %c0_i32 = arith.constant 0 : i32
    %c0_i32_0 = arith.constant 0 : i32
    return %arg1, %c0_i32 : i32, i32
  }
  func.func @transform_2(%arg0: i32, %arg1: i32) -> (i32, i32) {
    %c0_i32 = arith.constant 0 : i32
    %c0_i32_0 = arith.constant 0 : i32
    return %arg1, %c0_i32 : i32, i32
  }
  func.func @transform_3(%arg0: i32, %arg1: i32) -> (i32, i32) {
    %c0_i32 = arith.constant 0 : i32
    %c0_i32_0 = arith.constant 0 : i32
    return %c0_i32, %arg1 : i32, i32
  }
  func.func @transform_4(%arg0: i32, %arg1: i32) -> (i32, i32) {
    %c0_i32 = arith.constant 0 : i32
    %c0_i32_0 = arith.constant 0 : i32
    %c0_i32_1 = arith.constant 0 : i32
    return %c0_i32, %c0_i32_0 : i32, i32
  }
  func.func @transform_5(%arg0: i32, %arg1: i32) -> (i32, i32, i32) {
    %c0_i32 = arith.constant 0 : i32
    %c0_i32_0 = arith.constant 0 : i32
    %c0_i32_1 = arith.constant 0 : i32
    return %arg0, %c0_i32, %c0_i32_0 : i32, i32, i32
  }
  func.func @transform_6(%arg0: i32, %arg1: i32) -> (i32, i32, i32) {
    %c0_i32 = arith.constant 0 : i32
    %c0_i32_0 = arith.constant 0 : i32
    %c0_i32_1 = arith.constant 0 : i32
    return %arg0, %c0_i32, %c0_i32_0 : i32, i32, i32
  }
  func.func @transform_7(%arg0: i32, %arg1: i32) -> (i32, i32, i32) {
    %c0_i32 = arith.constant 0 : i32
    %c0_i32_0 = arith.constant 0 : i32
    %c0_i32_1 = arith.constant 0 : i32
    return %arg0, %c0_i32, %c0_i32_0 : i32, i32, i32
  }
  func.func @transform_8(%arg0: i32, %arg1: i32) -> (i32, i32) {
    %c0_i32 = arith.constant 0 : i32
    %c0_i32_0 = arith.constant 0 : i32
    %c0_i32_1 = arith.constant 0 : i32
    return %c0_i32, %c0_i32_0 : i32, i32
  }
  func.func @transform_9(%arg0: i32, %arg1: i32) -> (i32, i32) {
    %c0_i32 = arith.constant 0 : i32
    %c0_i32_0 = arith.constant 0 : i32
    %c0_i32_1 = arith.constant 0 : i32
    return %c0_i32, %c0_i32_0 : i32, i32
  }
  func.func @transform_10(%arg0: i32, %arg1: i32) -> (i32, i32) {
    %c0_i32 = arith.constant 0 : i32
    %c0_i32_0 = arith.constant 0 : i32
    %c0_i32_1 = arith.constant 0 : i32
    return %c0_i32, %c0_i32_0 : i32, i32
  }
  func.func @transform_11(%arg0: i32, %arg1: i32) -> (i32, i32) {
    %c0_i32 = arith.constant 0 : i32
    %c0_i32_0 = arith.constant 0 : i32
    %c0_i32_1 = arith.constant 0 : i32
    return %c0_i32, %c0_i32_0 : i32, i32
  }
  func.func @transform_12(%arg0: i32, %arg1: i32) -> (i32, i32) {
    %c0_i32 = arith.constant 0 : i32
    %c0_i32_0 = arith.constant 0 : i32
    %c0_i32_1 = arith.constant 0 : i32
    return %c0_i32, %c0_i32_0 : i32, i32
  }
  func.func @transform_13(%arg0: i32, %arg1: i32) -> (i32, i32) {
    %c0_i32 = arith.constant 0 : i32
    %c0_i32_0 = arith.constant 0 : i32
    %c0_i32_1 = arith.constant 0 : i32
    return %c0_i32, %c0_i32_0 : i32, i32
  }
  func.func @transform_14(%arg0: i32, %arg1: i32) -> (i32, i32) {
    %c0_i32 = arith.constant 0 : i32
    %c0_i32_0 = arith.constant 0 : i32
    %c0_i32_1 = arith.constant 0 : i32
    return %c0_i32, %c0_i32_0 : i32, i32
  }
  func.func @transform_15(%arg0: i32, %arg1: i32) -> (i32, i32) {
    %c0_i32 = arith.constant 0 : i32
    %c0_i32_0 = arith.constant 0 : i32
    %c0_i32_1 = arith.constant 0 : i32
    return %c0_i32, %c0_i32_0 : i32, i32
  }
  func.func @transform_16(%arg0: i32, %arg1: i32) -> (i32, i32) {
    %c0_i32 = arith.constant 0 : i32
    %c0_i32_0 = arith.constant 0 : i32
    %c0_i32_1 = arith.constant 0 : i32
    return %c0_i32, %c0_i32_0 : i32, i32
  }
}

</mosaic_0001>

<bundles_post_ra>
// kernel: tpu_custom_call.1
= control target key start
LH: loop header
LB: loop body
LE: loop exit
PB: predicated region body
PF: predicated region fallthrough
CT: control target
= control target key end

     0   :  { %s3193_s0 = inlined_call_operand.vmem [shape: f32[16,9], index: 0, kind: input, shape index: {}]   ;;  %s3194_s1 = inlined_call_operand.vmem [shape: f32[256,5], index: 1, kind: input, shape index: {}]   ;;  %s3195_s2 = inlined_call_operand.vmem [shape: s32[256,1], index: 2, kind: input, shape index: {}]   ;;  %s3196_s3 = inlined_call_operand.vmem [shape: s32[1,256], index: 3, kind: input, shape index: {}]   ;;  %s3197_s4 = inlined_call_operand.vmem [shape: f32[9,128], index: 4, kind: input, shape index: {}]   ;;  %s3198_s5 = inlined_call_operand.vmem [shape: f32[2,5,128], index: 5, kind: input, shape index: {}]   ;;  %s3199_s6 = inlined_call_operand.vmem [shape: f32[2,128,128], index: 6, kind: input, shape index: {}]   ;;  %s3200_s7 = inlined_call_operand.hbm [shape: f32[2,1,128], index: 7, kind: input, shape index: {}]   ;;  %s3201_s8 = inlined_call_operand.hbm [shape: f32[128,128], index: 8, kind: input, shape index: {}]   ;;  %s3202_s9 = inlined_call_operand.vmem [shape: f32[1,128], index: 9, kind: input, shape index: {}]   ;;  %s3203_s10 = inlined_call_operand.vmem [shape: f32[1,128], index: 10, kind: input, shape index: {}]   ;;  %s3204_s11 = inlined_call_operand.vmem [shape: f32[1,128], index: 11, kind: input, shape index: {}]   ;;  %s3205_s12 = inlined_call_operand.vmem [shape: f32[128,256], index: 12, kind: input, shape index: {}]   ;;  %s3206_s13 = inlined_call_operand.hbm [shape: f32[128,256], index: 13, kind: input, shape index: {}]   ;;  %s3207_s14 = inlined_call_operand.vmem [shape: f32[1,256], index: 14, kind: input, shape index: {}]   ;;  %s3208_s15 = inlined_call_operand.hbm [shape: f32[16,128], index: 15, kind: output, shape index: {0}]   ;;  %s3209_s16 = inlined_call_operand.hbm [shape: f32[1,128], index: 16, kind: output, shape index: {1}]  }
   0x1   :  { %3217 = sst [smem:[#allocation22_spill]] %s3193_s0 }
   0x2   :  { %3218 = sst [smem:[#allocation23_spill]] %s3194_s1 }
   0x3   :  { %3219 = sst [smem:[#allocation24_spill]] %s3200_s7 }
   0x4   :  { %3220 = sst [smem:[#allocation25_spill]] %s3201_s8 }
   0x5   :  { %3221 = sst [smem:[#allocation26_spill]] %s3203_s10 }
   0x6   :  { %3222 = sst [smem:[#allocation27_spill]] %s3204_s11 }
   0x7   :  { %3223 = sst [smem:[#allocation28_spill]] %s3206_s13 }
   0x8   :  { %3224 = sst [smem:[#allocation29_spill]] %s3207_s14 }
   0x9   :  { %3225 = sst [smem:[#allocation30_spill]] %s3208_s15 }
   0xa   :  { %3226 = sst [smem:[#allocation31_spill]] %s3209_s16 }
   0xb   :  { %22 = vsyncpa [#allocation6], 0 }
   0xc   :  { %24 = vsyncpa [#allocation6 + $0x1], 0 }
   0xd   :  { %25 = vsyncpa [#allocation9], 0 }
   0xe   :  { %26 = vsyncpa [#allocation7], 0 }
   0xf   :  { %27 = vsyncpa [#allocation13], 0  ;;  %s2705_s21 = smov 0   ;;  %s2707_s22 = smov 0  }
  0x10   :  { %s2709_s23 = smov 0   ;;  %s2711_s24 = smov 0  }
  0x11   :  { %s2713_s25 = smov 0   ;;  %s2715_s26 = smov 0  }
  0x12   :  { %s2717_s27 = smov 0   ;;  %s2719_s28 = smov 0  }
  0x13 LB: > { %3227 = sst [smem:[#allocation18_spill]] %s2594_s26  ;;  %s3211_s29 = sadd.s32 4294967295, %s2602_s28   ;;  %s2602_s28 = sphi %s2719_s28, %s33_s28   ;;  %s2598_s27 = sphi %s2717_s27, %s3260_s27   ;;  %s2594_s26 = sphi %s2715_s26, %s3259_s26   ;;  %s2590_s25 = sphi %s2713_s25, %s3258_s25   ;;  %s2586_s24 = sphi %s2711_s24, %s3252_s24   ;;  %s2582_s23 = sphi %s2709_s23, %s3257_s23   ;;  %s2578_s22 = sphi %s2707_s22, %s3256_s22   ;;  %s2574_s21 = sphi %s2705_s21, %s3255_s21  }
  0x14   : > { %3228 = sst [smem:[#allocation19_spill]] %s2602_s28  ;;  %p237_p0 = scmp.ne.s32.totalorder %s2578_s22, %s2574_s21 }
  0x15   : > { %p2747_p1 = scmp.eq.s32.totalorder %s3211_s29, 0  ;;  %p1980_p2 = scmp.ge.s32.totalorder %s2602_s28, 1 }
  0x16   : > { %p437_p3 = scmp.lt.s32.totalorder %s2602_s28, 5  ;;  %s2604_s18 = smov [#allocation8]  }
  0x17   : > { %s3229_s30 = scalar_select %p2747_p1, 1, 0 }
  0x18   : > { %p2755_p4 = por %p2747_p1, %p237_p0  ;;  %p2759_p5 = pnand %p1980_p2, %p437_p3 }
  0x19   : > { %s455_s19 = sshll.u32 %s2604_s18, 4  ;;  %s2605_s21 = smov [#allocation10]   ;;  %s456_s19 = int_to_ptr.vmem [resolvable:$true] %s455_s19 }
  0x1a   : > { %p2291_p6 = pneg %p2759_p5  ;;  %s480_s29 = sshll.u32 %s2605_s21, 4  ;;  %s481_s29 = int_to_ptr.vmem [resolvable:$true] %s480_s29 }
  0x1b   : > { %s2407_s16 = scalar_lea.vmem %s456_s19, 2048  ;;  %p2415_p12 = scmp.lt.s32.totalorder %s456_s19, %s456_s19 }
  0x1c   : > { %p2767_p7 = pnand %p2291_p6, %p2747_p1  ;;  %p2408_p9 = scmp.ne.s32.totalorder %s456_s19, %s2407_s16 }
  0x1d   : > { %p2416_p13 = scmp.lt.s32.totalorder %s2407_s16, %s2407_s16 }
  0x1e   : > { %p2398_p8 = pneg %p2767_p7 }
  0x1f   : > { %p2417_p0 = por %p2416_p13, %p2415_p12 }
  0x20   : > { %p2410_p10 = pnand %p2408_p9, %p2398_p8 }
  0x22   : > { %p2411_p11 = pneg %p2410_p10 }
  0x24   : > { %p2418_p2 = pnand %p2417_p0, %p2411_p11 }
  0x26   : > { %2421 = shalt.err (!%p2418_p2)
}
  0x27   : > { %s2606_s18 = smov 128   ;;  %s2607_s15 = smov 8  }
  0x28   : > { %s3233_s8 = sld [smem:[#allocation25_spill]]  ;;  %s2433_s10 = scalar_lea.vmem %s481_s29, 4096 }
  0x29   : > { %p2434_p3 = scmp.ne.s32.totalorder %s481_s29, %s2433_s10  ;;  %p2441_p10 = scmp.lt.s32.totalorder %s481_s29, %s481_s29 }
  0x2a   : > { %p2442_p1 = scmp.lt.s32.totalorder %s2433_s10, %s2433_s10 }
  0x2b   : > { %p2436_p6 = pnand %p2434_p3, %p2398_p8 }
  0x2c   : > { %p2443_p12 = por %p2442_p1, %p2441_p10 }
  0x2d   : > { %p2437_p9 = pneg %p2436_p6 }
  0x2e   : > { %2294 = dma.hbm_to_vmem [thread:$0]  (!%p2767_p7), %s3233_s8, 2048, %s456_s19, [#allocation9], %s2606_s18, %s2606_s18, %s2607_s15  }
  0x2f   : > { %p2444_p11 = pnand %p2443_p12, %p2437_p9 }
  0x31   : > { %2447 = shalt.err (!%p2444_p11)
}
  0x32   : > { %s2608_s16 = smov 256   ;;  %s2609_s11 = smov 16  }
  0x33   : > { %s3234_s13 = sld [smem:[#allocation28_spill]]  ;;  %s42_s10 = sadd.s32 1, %s2594_s26 }
  0x34   : > { %p43_p1 = scmp.ge.s32.totalorder %s42_s10, 2  ;;  %s45_s18 = sadd.s32 1, %s2598_s27 }
  0x35   : > { %p231_p8 = scmp.ne.s32.totalorder %s2582_s23, %s2578_s22  ;;  %p232_p13 = scmp.eq.s32.totalorder %s2602_s28, 0 }
  0x36   : > { %s3262_s10 = smov (%p43_p1, %s42_s10), 0  ;;  %s3264_s18 = smov (!%p43_p1, %s45_s18), %s2598_s27 }
  0x37   : > { %3235 = sst [smem:[#allocation20_spill]] %s3262_s10  ;;  %s224_s21 = sadd.s32 1, %s2582_s23 }
  0x38   : > { %p233_p0 = por %p232_p13, %p231_p8  ;;  %p47_p2 = scmp.ge.s32.totalorder %s3264_s18, 2 }
  0x39   : > { %2297 = dma.hbm_to_vmem [thread:$0]  (!%p2767_p7), %s3234_s13, 4096, %s481_s29, [#allocation9], %s2608_s16, %s2608_s16, %s2609_s11  }
  0x3a   : > { %s536_s8 = sand.u32 1, %s2582_s23   ;;  %p2304_p3 = scmp.lt.s32.totalorder %s2602_s28, 4 }
  0x3b   : > { %s3266_s18 = smov (%p47_p2, %s3264_s18), 0  ;;  %s1984_s20 = sshll.u32 %s2598_s27, 4 }
  0x3c   : > { %3236 = sst [smem:[#allocation21_spill]] %s3266_s18  ;;  %s539_s29 = scalar_lea.vmem [#allocation5], %s536_s8 }
  0x3d   : > { %s546_s16 = sshll.u32 %s539_s29, 4  ;;  %s221_s11 = ssub.s32 %s2598_s27, %s3266_s18  ;;  %s547_s16 = int_to_ptr.vmem [resolvable:$true] %s546_s16 }
  0x3e   : > { %p222_p7 = scmp.eq.s32.totalorder %s221_s11, 0  ;;  %s3237_s7 = sld [smem:[#allocation24_spill]] }
  0x3f   : > { %p2808_p6 = pnand %p2304_p3, %p233_p0  ;;  %s537_s28 = scalar_lea.sflag [#allocation6], %s536_s8 }
  0x40   : > { %s2813_s26 = scalar_select %p222_p7, %s2582_s23, %s224_s21  }
  0x41   : > { %p2450_p9 = pneg %p2808_p6  ;;  %s2461_s14 = scalar_lea.vmem %s547_s16, 16 }
  0x42   : > { %p2462_p10 = scmp.ne.s32.totalorder %s547_s16, %s2461_s14  ;;  %s2610_s29 = smov [#allocation5]  }
  0x43   : > { %s2466_s11 = sshll.u32 %s2610_s29, 4  ;;  %s2467_s11 = int_to_ptr.vmem [resolvable:$false] %s2466_s11 }
  0x44   : > { %s544_s13 = scalar_lea.hbm %s3237_s7, %s1984_s20  ;;  %p2464_p12 = pnand %p2462_p10, %p2450_p9 }
  0x45   : > { %s2468_s15 = scalar_lea.vmem %s2467_s11, 32  ;;  %p2469_p1 = scmp.lt.s32.totalorder %s547_s16, %s2467_s11 }
  0x46   : > { %p2465_p11 = pneg %p2464_p12  ;;  %p2470_p8 = scmp.lt.s32.totalorder %s2468_s15, %s2461_s14 }
  0x48   : > { %p2471_p13 = por %p2470_p8, %p2469_p1 }
  0x4a   : > { %p2472_p0 = pnand %p2471_p13, %p2465_p11 }
  0x4c   : > { %2475 = shalt.err (!%p2472_p0)
}
  0x4d   : > { %2301 = dma.hbm_to_vmem [thread:$0]  (!%p2808_p6), %s544_s13, 16, %s547_s16, %s537_s28  }
  0x4e   : > { %555 = sbr.rel (%p2759_p5) target bundleno = 1730 (0x6c2), region = 80  ;;  %s557_s8 = sand.u32 (!%p2759_p5), 1, %s2578_s22  }
  0x4f   : > { %s558_s21 = scalar_lea.sflag (!%p2759_p5), [#allocation6], %s557_s8  ;;  %s2822_s20 = scalar_lea.vmem (!%p2759_p5), [#allocation5], %s557_s8 }
  0x53   : > { %2557 = dma.done.wait (%p2755_p4), %s558_s21, 16  }
  0x54   : > { %2559 = vsyncadd (%p2755_p4), %s558_s21, 4294967280  ;;  %p3239_p2 = scmp.ne.s32.totalorder %s3229_s30, 0 }
  0x56   : > { %2561 = dma.done.wait (%p3239_p2), [#allocation9], 6144  }
  0x57   : > { %2563 = vsyncadd (%p3239_p2), [#allocation9], 4294961152  ;;  %s1988_s13 = sshll.u32 %s2586_s24, 4  ;;  %p645_p5 = scmp.lt.s32.totalorder %s2586_s24, 1 }
  0x58   : > { %p634_p3 = scmp.lt.s32.totalorder %s1988_s13, 31  ;;  %p648_p7 = scmp.lt.s32.totalorder %s2590_s25, 1 }
  0x59   : > { %s2836_s14 = scalar_select %p645_p5, %s2586_s24, 1 }
  0x5a   : > { %s3268_s13 = smov (!%p634_p3, %s1988_s13), 31  ;;  %p658_p4 = scmp.eq.s32.totalorder %s2590_s25, 0 }
  0x5b   : > { %s1989_s17 = sshll.u32 %s3268_s13, 3  ;;  %p659_p6 = scmp.eq.s32.totalorder %s2586_s24, 0 }
  0x5c   : > { %s3240_s1 = sld [smem:[#allocation23_spill]]  ;;  %s2852_s15 = scalar_lea.vmem %s3195_s2, %s1989_s17 }
  0x5d   : > { %s649_s8 = scalar_select %p648_p7, %s2590_s25, 1 }
  0x5e   : > { %p660_p9 = pnand %p659_p6, %p658_p4 }
  0x5f   : > { %s1992_s21 = sshll.u32 %s649_s8, 3  ;;  %s2056_s7 = sshll.u32 %s649_s8, 7 }
  0x60   : > { %s2858_s0 = scalar_lea.vmem %s3198_s5, %s1992_s21  ;;  %s2863_s10 = scalar_lea.vmem %s3199_s6, %s2056_s7 }
  0x61   : > { %663 = sbr.rel (%p660_p9) target bundleno = 303 (0x12f), region = 96  ;;  %s3241_s18 = sld [smem:[#allocation22_spill]] (!%p660_p9) }
  0x62   : > { %s2847_s19 = scalar_lea.vmem %s3240_s1, %s1989_s17 }
  0x66   : > { %v667_v0 = vld [vmem:[%s3197_s4 + $0x8] sm:$0x1]  ;;  %vm675_vm0 = vcmask 1040384   ;;  %v666_v1 = vld [vmem:[%s3197_s4] sm:$0xff]  ;;  %vm668_vm1 = vcmask 72704  }
  0x67   : > { %v664_v2 = vld [vmem:[%s3241_s18] sm:$0xff]  ;;  %2132 = vmatprep.subr.msk.mxu0 %vm675_vm0, %v667_v0  ;;  %v665_v3 = vld [vmem:[%s3241_s18 + $0x8] sm:$0xff] }
  0x68   : > { %2136 = vmatprep.mubr.msk.f32.mxu0 %vm668_vm1, %v664_v2  ;;  %2133 = vmatpush3.msk.msra.mxu0 %vm675_vm0, %v667_v0 }
  0x69   : > { %2134 = vmatprep.subr.mxu0 %v666_v1 }
  0x6a   : > { %2135 = vmatpush3.msra.mxu0 %v666_v1 }
  0x6b   : > { %2137 = vmatmul.mubr.msk.f32.vlgmr.msra.gmra.mxu0 %vm668_vm1, %v665_v3 }
 0x12b   : > { %v2138_v4 = vpop.f32.mrf.mxu0 }
 0x12c   : > { %755 = vst [vmem:[#allocation2 + $0x8] sm:$0xff] %v2138_v4  ;;  %757 = vst [vmem:[#allocation3] sm:$0xff] %v2138_v4 }
 0x12d   : > { %v745_v5 = vpop.f32.mrf.mxu0 }
 0x12e   : > { %754 = vst [vmem:[#allocation2] sm:$0xff] %v745_v5  ;;  %756 = vst [vmem:[#allocation3 + $0x8] sm:$0xff] %v745_v5 }
 0x12f PF: > { %p1998_p10 = scmp.ne.s32.totalorder %s2586_s24, 0 }
 0x131   : > { %760 = sbr.rel (%p1998_p10) target bundleno = 312 (0x138), region = 100 }
 0x136   : > { %v761_v6 = vld [vmem:[#allocation2] sm:$0xff]  ;;  %v762_v7 = vld [vmem:[#allocation2 + $0x8] sm:$0xff] }
 0x137   : > { %763 = vst [vmem:[#allocation4 + $0x8] sm:$0xff] %v761_v6  ;;  %764 = vst [vmem:[#allocation4] sm:$0xff] %v762_v7 }
 0x138 PF: > { %v984_v8 = vld [vmem:[%s2852_s15 + $0x10] sm:$0xff]  ;;  %v982_v9 = vld [vmem:[%s2852_s15] sm:$0xff]  ;;  %v2611_v10 = vmov 0   ;;  %v985_v11 = vld [vmem:[%s2852_s15 + $0x18] sm:$0xff]  ;;  %vm831_vm2 = vcmask 1044480   ;;  %vm782_vm3 = vcmask 39936   ;;  %v980_v46 = vlaneseq }
 0x139   : > { %2391 = vset.pattern.permute.xlu1 %v2611_v10  ;;  %2390 = vset.pattern.permute.xlu0 %v2611_v10  ;;  %v983_v12 = vld [vmem:[%s2852_s15 + $0x8] sm:$0xff]  ;;  %v781_v13 = vld [vmem:[%s2858_s0] sm:$0x1f]  ;;  %v767_v21 = vld [vmem:[%s2847_s19 + $0x10] sm:$0xff]  ;;  %v2612_v26 = vmov 0.0   ;;  %vm1105_vm8 = vcmask 130048  }
 0x13a   : > { %1005 = vperm.xlu1 %2391, %v984_v8   ;;  %999 = vperm.xlu0 %2390, %v982_v9   ;;  %v765_v14 = vld [vmem:[%s2847_s19] sm:$0xff]  ;;  %v766_v15 = vld [vmem:[%s2847_s19 + $0x8] sm:$0xff]  ;;  %v768_v22 = vld [vmem:[%s2847_s19 + $0x18] sm:$0xff]  ;;  %v2929_v47 = vand.u32 127, %v980_v46  ;;  %p1313_p12 = scmp.eq.s32.totalorder %s2586_s24, 1  ;;  %p2045_p11 = scmp.ne.s32.totalorder %s2586_s24, 1 }
 0x13b   : > { %v1102_v16 = vld [vmem:[#allocation2] sm:$0xff]  ;;  %v1103_v17 = vld [vmem:[#allocation2 + $0x8] sm:$0xff]  ;;  %2139 = vmatprep.subr.msk.mxu0 %vm831_vm2, %v781_v13  ;;  %2141 = vmatprep.mubr.msk.f32.mxu0 %vm782_vm3, %v765_v14  ;;  %v989_v23 = vld [vmem:[%s2852_s15 + $0x38] sm:$0xff] }
 0x13c   : > { %v987_v18 = vld [vmem:[%s2852_s15 + $0x28] sm:$0xff]  ;;  %v986_v19 = vld [vmem:[%s2852_s15 + $0x20] sm:$0xff]  ;;  %v1104_v20 = vpack.c.bf16 %v1103_v17, %v1102_v16  ;;  %2140 = vmatpush3.msk.msra.mxu0 %vm831_vm2, %v781_v13  ;;  %v988_v24 = vld [vmem:[%s2852_s15 + $0x30] sm:$0xff] }
 0x13d   : > { %2142 = vmatmul.mubr.msk.f32.vlgmr.msra.gmra.mxu0 %vm782_vm3, %v766_v15  ;;  %v769_v25 = vld [vmem:[%s2847_s19 + $0x20] sm:$0xff]  ;;  %2183 = vmatprep.subr.bf16.mxu0 %v2612_v26  ;;  %v770_v27 = vld [vmem:[%s2847_s19 + $0x28] sm:$0xff]  ;;  %v771_v30 = vld [vmem:[%s2847_s19 + $0x30] sm:$0xff] }
 0x13e   : > { %1008 = vperm.xlu1 %2391, %v985_v11   ;;  %1002 = vperm.xlu0 %2390, %v983_v12   ;;  %v991_v28 = vld [vmem:[%s2852_s15 + $0x48] sm:$0xff]  ;;  %v990_v29 = vld [vmem:[%s2852_s15 + $0x40] sm:$0xff]  ;;  %v772_v31 = vld [vmem:[%s2847_s19 + $0x38] sm:$0xff] }
 0x13f   : > { %2165 = vmatprep.subr.bf16.mxu1 %v1104_v20  ;;  %2144 = vmatprep.mubr.msk.f32.mxu0 %vm782_vm3, %v767_v21  ;;  %v993_v32 = vld [vmem:[%s2852_s15 + $0x58] sm:$0xff]  ;;  %v992_v33 = vld [vmem:[%s2852_s15 + $0x50] sm:$0xff]  ;;  %v773_v34 = vld [vmem:[%s2847_s19 + $0x40] sm:$0xff] }
 0x140   : > { %2166 = vmatpush3.bf16.msra.mxu1 %v1104_v20  ;;  %v774_v35 = vld [vmem:[%s2847_s19 + $0x48] sm:$0xff]  ;;  %v994_v37 = vld [vmem:[%s2852_s15 + $0x60] sm:$0xff]  ;;  %v775_v38 = vld [vmem:[%s2847_s19 + $0x50] sm:$0xff] }
 0x141   : > { %2145 = vmatmul.mubr.msk.f32.gmra.mxu0 %vm782_vm3, %v768_v22  ;;  %v995_v36 = vld [vmem:[%s2852_s15 + $0x68] sm:$0xff]  ;;  %v776_v39 = vld [vmem:[%s2847_s19 + $0x58] sm:$0xff]  ;;  %v996_v41 = vld [vmem:[%s2852_s15 + $0x70] sm:$0xff] }
 0x142   : > { %1014 = vperm.xlu1 %2391, %v987_v18   ;;  %1011 = vperm.xlu0 %2390, %v986_v19   ;;  %v997_v40 = vld [vmem:[%s2852_s15 + $0x78] sm:$0xff]  ;;  %v777_v42 = vld [vmem:[%s2847_s19 + $0x60] sm:$0xff]  ;;  %v778_v43 = vld [vmem:[%s2847_s19 + $0x68] sm:$0xff]  ;;  %s3242_s15 = scalar_lea.vmem %s3196_s3, %s2836_s14 }
 0x143   : > { %2147 = vmatprep.mubr.msk.f32.mxu0 %vm782_vm3, %v769_v25  ;;  %v779_v44 = vld [vmem:[%s2847_s19 + $0x70] sm:$0xff]  ;;  %v780_v45 = vld [vmem:[%s2847_s19 + $0x78] sm:$0xff] }
 0x145   : > { %2148 = vmatmul.mubr.msk.f32.gmra.mxu0 %vm782_vm3, %v770_v27 }
 0x146   : > { %1020 = vperm.xlu1 %2391, %v989_v23   ;;  %1017 = vperm.xlu0 %2390, %v988_v24  }
 0x147   : > { %2150 = vmatprep.mubr.msk.f32.mxu0 %vm782_vm3, %v771_v30 }
 0x149   : > { %2151 = vmatmul.mubr.msk.f32.gmra.mxu0 %vm782_vm3, %v772_v31 }
 0x14a   : > { %1026 = vperm.xlu1 %2391, %v991_v28   ;;  %1023 = vperm.xlu0 %2390, %v990_v29  }
 0x14b   : > { %2153 = vmatprep.mubr.msk.f32.mxu0 %vm782_vm3, %v773_v34 }
 0x14d   : > { %2154 = vmatmul.mubr.msk.f32.gmra.mxu0 %vm782_vm3, %v774_v35 }
 0x14e   : > { %1032 = vperm.xlu1 %2391, %v993_v32   ;;  %1029 = vperm.xlu0 %2390, %v992_v33  }
 0x14f   : > { %2156 = vmatprep.mubr.msk.f32.mxu0 %vm782_vm3, %v775_v38 }
 0x151   : > { %2157 = vmatmul.mubr.msk.f32.gmra.mxu0 %vm782_vm3, %v776_v39 }
 0x152   : > { %1038 = vperm.xlu1 %2391, %v995_v36   ;;  %1035 = vperm.xlu0 %2390, %v994_v37  }
 0x153   : > { %2159 = vmatprep.mubr.msk.f32.mxu0 %vm782_vm3, %v777_v42 }
 0x155   : > { %2160 = vmatmul.mubr.msk.f32.gmra.mxu0 %vm782_vm3, %v778_v43 }
 0x156   : > { %1044 = vperm.xlu1 %2391, %v997_v40   ;;  %1041 = vperm.xlu0 %2390, %v996_v41  }
 0x157   : > { %2162 = vmatprep.mubr.msk.f32.mxu0 %vm782_vm3, %v779_v44 }
 0x159   : > { %2163 = vmatmul.mubr.msk.f32.gmra.mxu0 %vm782_vm3, %v780_v45 }
 0x1b5   : > { %v1006_v48 = vpop.permute.xlu1 %1005  ;;  %v1000_v49 = vpop.permute.xlu0 %999 }
 0x1b6   : > { %vm1048_vm4 = vcmp.eq.s32.totalorder %v2929_v47, %v1006_v48  ;;  %vm1046_vm5 = vcmp.eq.s32.totalorder %v2929_v47, %v1000_v49 }
 0x1b7   : > { %v2018_v52 = vsel %vm1048_vm4, 1.0, %v2612_v26  ;;  %v2016_v53 = vsel %vm1046_vm5, 1.0, %v2612_v26  ;;  %vm2613_vm5 = vmmov 0  }
 0x1b8   : > { %2199 = vmatprep.mubr.msk.bf16.mxu0 %vm2613_vm5, %v2612_v26 }
 0x1b9   : > { %v1009_v50 = vpop.permute.xlu1 %1008  ;;  %v1003_v51 = vpop.permute.xlu0 %1002 }
 0x1ba   : > { %vm1049_vm6 = vcmp.eq.s32.totalorder %v2929_v47, %v1009_v50  ;;  %vm1047_vm7 = vcmp.eq.s32.totalorder %v2929_v47, %v1003_v51 }
 0x1bb   : > { %v2019_v54 = vsel %vm1049_vm6, 1.0, %v2612_v26  ;;  %v2017_v55 = vsel %vm1047_vm7, 1.0, %v2612_v26 }
 0x1bc   : > { %v1095_v56 = vpack.c.bf16 %v2019_v54, %v2018_v52  ;;  %v1094_v57 = vpack.c.bf16 %v2017_v55, %v2016_v53 }
 0x1bd   : > { %v1015_v58 = vpop.permute.xlu1 %1014  ;;  %v1012_v59 = vpop.permute.xlu0 %1011 }
 0x1be   : > { %vm1051_vm9 = vcmp.eq.s32.totalorder %v2929_v47, %v1015_v58  ;;  %vm1050_vm10 = vcmp.eq.s32.totalorder %v2929_v47, %v1012_v59  ;;  %2167 = vmatprep.mubr.msk.bf16.mxu1 %vm1105_vm8, %v1094_v57 }
 0x1bf   : > { %v2021_v60 = vsel %vm1051_vm9, 1.0, %v2612_v26  ;;  %v2020_v61 = vsel %vm1050_vm10, 1.0, %v2612_v26  ;;  %2168 = vmatmul.mubr.msk.bf16.vlgmr.msra.gmra.mxu1 %vm1105_vm8, %v1095_v56 }
 0x1c0   : > { %v1096_v62 = vpack.c.bf16 %v2021_v60, %v2020_v61 }
 0x1c1   : > { %v1021_v63 = vpop.permute.xlu1 %1020  ;;  %v1018_v0 = vpop.permute.xlu0 %1017 }
 0x1c2   : > { %vm1053_vm11 = vcmp.eq.s32.totalorder %v2929_v47, %v1021_v63  ;;  %vm1052_vm12 = vcmp.eq.s32.totalorder %v2929_v47, %v1018_v0  ;;  %2171 = vmatprep.mubr.msk.bf16.mxu1 %vm1105_vm8, %v1096_v62 }
 0x1c3   : > { %v2023_v1 = vsel %vm1053_vm11, 1.0, %v2612_v26  ;;  %v2022_v2 = vsel %vm1052_vm12, 1.0, %v2612_v26 }
 0x1c4   : > { %v1097_v3 = vpack.c.bf16 %v2023_v1, %v2022_v2 }
 0x1c5   : > { %v1027_v4 = vpop.permute.xlu1 %1026  ;;  %v1024_v5 = vpop.permute.xlu0 %1023 }
 0x1c6   : > { %vm1055_vm13 = vcmp.eq.s32.totalorder %v2929_v47, %v1027_v4  ;;  %vm1054_vm14 = vcmp.eq.s32.totalorder %v2929_v47, %v1024_v5 }
 0x1c7   : > { %v2025_v6 = vsel %vm1055_vm13, 1.0, %v2612_v26  ;;  %v2024_v7 = vsel %vm1054_vm14, 1.0, %v2612_v26  ;;  %2172 = vmatmul.mubr.msk.bf16.gmra.mxu1 %vm1105_vm8, %v1097_v3 }
 0x1c8   : > { %v1098_v8 = vpack.c.bf16 %v2025_v6, %v2024_v7 }
 0x1c9   : > { %v1033_v9 = vpop.permute.xlu1 %1032  ;;  %v1030_v10 = vpop.permute.xlu0 %1029 }
 0x1ca   : > { %vm1057_vm15 = vcmp.eq.s32.totalorder %v2929_v47, %v1033_v9  ;;  %vm1056_vm0 = vcmp.eq.s32.totalorder %v2929_v47, %v1030_v10  ;;  %2175 = vmatprep.mubr.msk.bf16.mxu1 %vm1105_vm8, %v1098_v8 }
 0x1cb   : > { %v2027_v11 = vsel %vm1057_vm15, 1.0, %v2612_v26  ;;  %v2026_v12 = vsel %vm1056_vm0, 1.0, %v2612_v26 }
 0x1cc   : > { %v1099_v13 = vpack.c.bf16 %v2027_v11, %v2026_v12 }
 0x1cd   : > { %v1039_v14 = vpop.permute.xlu1 %1038  ;;  %v1036_v15 = vpop.permute.xlu0 %1035 }
 0x1ce   : > { %vm1059_vm1 = vcmp.eq.s32.totalorder %v2929_v47, %v1039_v14  ;;  %vm1058_vm2 = vcmp.eq.s32.totalorder %v2929_v47, %v1036_v15 }
 0x1cf   : > { %v2029_v16 = vsel %vm1059_vm1, 1.0, %v2612_v26  ;;  %v2028_v17 = vsel %vm1058_vm2, 1.0, %v2612_v26  ;;  %2176 = vmatmul.mubr.msk.bf16.gmra.mxu1 %vm1105_vm8, %v1099_v13 }
 0x1d0   : > { %v1100_v18 = vpack.c.bf16 %v2029_v16, %v2028_v17 }
 0x1d1   : > { %v1045_v19 = vpop.permute.xlu1 %1044  ;;  %v1042_v20 = vpop.permute.xlu0 %1041 }
 0x1d2   : > { %vm1061_vm3 = vcmp.eq.s32.totalorder %v2929_v47, %v1045_v19  ;;  %vm1060_vm4 = vcmp.eq.s32.totalorder %v2929_v47, %v1042_v20  ;;  %2179 = vmatprep.mubr.msk.bf16.mxu1 %vm1105_vm8, %v1100_v18 }
 0x1d3   : > { %v2031_v21 = vsel %vm1061_vm3, 1.0, %v2612_v26  ;;  %v2030_v22 = vsel %vm1060_vm4, 1.0, %v2612_v26 }
 0x1d4   : > { %v1101_v23 = vpack.c.bf16 %v2031_v21, %v2030_v22 }
 0x1d7   : > { %2180 = vmatmul.mubr.msk.bf16.gmra.mxu1 %vm1105_vm8, %v1101_v23 }
 0x1fd   : > { %v2972_v24 = vpop.f32.mrf.mxu0 }
 0x1ff   : > { %v2974_v25 = vpop.f32.mrf.mxu0 }
 0x201   : > { %v2976_v27 = vpop.f32.mrf.mxu0 }
 0x203   : > { %v2978_v28 = vpop.f32.mrf.mxu0 }
 0x205   : > { %v2149_v29 = vpop.f32.mrf.mxu0 }
 0x207   : > { %v921_v30 = vpop.f32.mrf.mxu0 }
 0x209   : > { %v2152_v31 = vpop.f32.mrf.mxu0 }
 0x20b   : > { %v931_v32 = vpop.f32.mrf.mxu0 }
 0x20d   : > { %v2155_v33 = vpop.f32.mrf.mxu0 }
 0x20f   : > { %v941_v35 = vpop.f32.mrf.mxu0 }
 0x211   : > { %v2158_v38 = vpop.f32.mrf.mxu0 }
 0x213   : > { %v951_v41 = vpop.f32.mrf.mxu0 }
 0x215   : > { %v2161_v44 = vpop.f32.mrf.mxu0 }
 0x217   : > { %v961_v49 = vpop.f32.mrf.mxu0 }
 0x219   : > { %v2164_v52 = vpop.f32.mrf.mxu0 }
 0x21b   : > { %v971_v54 = vpop.f32.mrf.mxu0 }
 0x27f   : > { %v2169_v34 = vpop.f32.mrf.mxu1 }
 0x281   : > { %v2980_v36 = vpop.f32.mrf.mxu1 }
 0x283   : > { %v2170_v37 = vpop.f32.mrf.mxu1 }
 0x284   : > { %v1176_v21 = vadd.f32 %v2170_v37, %v2976_v27  ;;  %v1165_v27 = vadd.f32 %v2980_v36, %v2974_v25  ;;  %v2614_v25 = vmov 1.0|1.0   ;;  %v1258_v36 = vld [vmem:[#allocation4 + $0x8] sm:$0xff] }
 0x285   : > { %v1167_v39 = vpop.f32.mrf.mxu1 }
 0x287   : > { %v2173_v40 = vpop.f32.mrf.mxu1 }
 0x288   : > { %v1189_v14 = vadd.f32 %v2173_v40, %v931_v32  ;;  %v1227_v40 = vmax.f32 %v1165_v27, 0.0 }
 0x289   : > { %v1180_v42 = vpop.f32.mrf.mxu1 }
 0x28a   : > { %v1233_v19 = vmax.f32 %v1189_v14, 0.0  ;;  %v1181_v20 = vadd.f32 %v1180_v42, %v921_v30  ;;  %v1168_v30 = vadd.f32 %v2972_v24, %v1167_v39 }
 0x28b   : > { %v2174_v43 = vpop.f32.mrf.mxu1 }
 0x28c   : > { %v1192_v11 = vadd.f32 %v2174_v43, %v2152_v31  ;;  %v1173_v31 = vadd.f32 %v2169_v34, %v2978_v28  ;;  %v1231_v32 = vmax.f32 %v1181_v20, 0.0  ;;  %v1228_v37 = vmax.f32 %v1168_v30, 0.0  ;;  %v1259_v43 = vld [vmem:[#allocation4] sm:$0xff] }
 0x28d   : > { %v1183_v45 = vpop.f32.mrf.mxu1 }
 0x28e   : > { %v1234_v16 = vmax.f32 %v1192_v11, 0.0  ;;  %v1184_v17 = vadd.f32 %v2149_v29, %v1183_v45  ;;  %v1230_v29 = vmax.f32 %v1176_v21, 0.0  ;;  %v1260_v24 = vpack.c.bf16 %v1228_v37, %v1227_v40 }
 0x28f   : > { %v2177_v48 = vpop.f32.mrf.mxu1 }
 0x290   : > { %v1205_v4 = vadd.f32 %v2177_v48, %v951_v41  ;;  %v1263_v22 = vpack.c.bf16 %v1234_v16, %v1233_v19  ;;  %v1232_v23 = vmax.f32 %v1184_v17, 0.0 }
 0x291   : > { %v1196_v50 = vpop.f32.mrf.mxu1 }
 0x292   : > { %v1237_v9 = vmax.f32 %v1205_v4, 0.0  ;;  %v1197_v10 = vadd.f32 %v1196_v50, %v941_v35  ;;  %v1262_v35 = vpack.c.bf16 %v1232_v23, %v1231_v32 }
 0x293   : > { %v2178_v51 = vpop.f32.mrf.mxu1 }
 0x294   : > { %v1208_v1 = vadd.f32 %v2178_v51, %v2158_v38  ;;  %v1235_v15 = vmax.f32 %v1197_v10, 0.0  ;;  %v1229_v38 = vmax.f32 %v1173_v31, 0.0 }
 0x295   : > { %v1199_v53 = vpop.f32.mrf.mxu1 }
 0x296   : > { %v1238_v6 = vmax.f32 %v1208_v1, 0.0  ;;  %v1200_v7 = vadd.f32 %v2155_v33, %v1199_v53  ;;  %v2990_v33 = vshrl.u32 %v980_v46, 7  ;;  %v1261_v34 = vpack.c.bf16 %v1230_v29, %v1229_v38  ;;  %v2040_v46 = vld [vmem:[%s3242_s15] ss:$0 sm:$0xff] }
 0x297   : > { %v2181_v55 = vpop.f32.mrf.mxu1 }
 0x298   : > { %v1221_v57 = vadd.f32 %v2181_v55, %v971_v54  ;;  %v1265_v12 = vpack.c.bf16 %v1238_v6, %v1237_v9  ;;  %v1236_v13 = vmax.f32 %v1200_v7, 0.0  ;;  %v1245_v28 = vadd.s32 8, %v2990_v33 }
 0x299   : > { %v1212_v56 = vpop.f32.mrf.mxu1  ;;  %vm1251_vm6 = vcmp.eq.s32.totalorder %v2990_v33, %v2040_v46 }
 0x29a   : > { %v1241_v61 = vmax.f32 %v1221_v57, 0.0  ;;  %v1213_v62 = vadd.f32 %v1212_v56, %v961_v49  ;;  %v1264_v18 = vpack.c.bf16 %v1236_v13, %v1235_v15  ;;  %vm1252_vm7 = vcmp.eq.s32.totalorder %v1245_v28, %v2040_v46 }
 0x29b   : > { %v2182_v58 = vpop.f32.mrf.mxu1  ;;  %vm2043_vm8 = vmpackc.low %vm1252_vm7, %vm1251_vm6 }
 0x29c   : > { %v1224_v59 = vadd.f32 %v2182_v58, %v2164_v52  ;;  %v1239_v5 = vmax.f32 %v1213_v62, 0.0 }
 0x29d   : > { %v1215_v60 = vpop.f32.mrf.mxu1 }
 0x29e   : > { %v1242_v63 = vmax.f32 %v1224_v59, 0.0  ;;  %v1216_v0 = vadd.f32 %v2161_v44, %v1215_v60 }
 0x2a0   : > { %v1267_v2 = vpack.c.bf16 %v1242_v63, %v1241_v61  ;;  %v1240_v3 = vmax.f32 %v1216_v0, 0.0 }
 0x2a2   : > { %2184 = vmatpush3.bf16.msra.mxu0 %v1267_v2  ;;  %v1266_v8 = vpack.c.bf16 %v1240_v3, %v1239_v5 }
 0x2a3   : > { %2185 = vmatprep.subr.bf16.mxu0 %v2612_v26 }
 0x2a6   : > { %2186 = vmatpush3.bf16.msra.mxu0 %v1266_v8 }
 0x2a7   : > { %2187 = vmatprep.subr.bf16.mxu0 %v2612_v26 }
 0x2aa   : > { %2188 = vmatpush3.bf16.msra.mxu0 %v1265_v12 }
 0x2ab   : > { %2189 = vmatprep.subr.bf16.mxu0 %v2612_v26 }
 0x2ae   : > { %2190 = vmatpush3.bf16.msra.mxu0 %v1264_v18 }
 0x2af   : > { %2191 = vmatprep.subr.bf16.mxu0 %v2612_v26 }
 0x2b2   : > { %2192 = vmatpush3.bf16.msra.mxu0 %v1263_v22 }
 0x2b3   : > { %2193 = vmatprep.subr.bf16.mxu0 %v2612_v26 }
 0x2b6   : > { %2194 = vmatpush3.bf16.msra.mxu0 %v1262_v35 }
 0x2b7   : > { %2195 = vmatprep.subr.bf16.mxu0 %v2612_v26 }
 0x2ba   : > { %2196 = vmatpush3.bf16.msra.mxu0 %v1261_v34 }
 0x2bb   : > { %2197 = vmatprep.subr.bf16.mxu0 %v2612_v26 }
 0x2be   : > { %2198 = vmatpush3.bf16.msra.mxu0 %v1260_v24 }
 0x2c1   : > { %2200 = vmatmul.mubr.msk.bf16.vlgmr.msra.gmra.mxu0 %vm2043_vm8, %v2614_v25 }
 0x381   : > { %v1302_v39 = vpop.f32.mrf.mxu0 }
 0x382   : > { %v1309_v41 = vadd.f32 %v1302_v39, %v1258_v36 }
 0x383   : > { %v2201_v42 = vpop.f32.mrf.mxu0 }
 0x384   : > { %1311 = vst [vmem:[#allocation4 + $0x8] sm:$0xff] %v1309_v41  ;;  %1316 = sbr.rel (%p2045_p11) target bundleno = 1139 (0x473), region = 104 }
 0x385   : > { %v1305_v44 = vpop.f32.mrf.mxu0 }
 0x386   : > { %v1310_v45 = vadd.f32 %v1305_v44, %v1259_v43 }
 0x387   : > { %v2202_v48 = vpop.f32.mrf.mxu0 }
 0x388   : > { %1312 = vst [vmem:[#allocation4] sm:$0xff] %v1310_v45 }
 0x389   : > { %v1334_v26 = vld [vmem:[%s2863_s10 + $0x78] sm:$0xff]  ;;  %v1333_v49 = vld [vmem:[%s2863_s10 + $0x70] sm:$0xff]  ;;  %v1332_v50 = vld [vmem:[%s2863_s10 + $0x68] sm:$0xff] }
 0x38a   : > { %2203 = vmatprep.subr.mxu0 %v1334_v26  ;;  %v1331_v51 = vld [vmem:[%s2863_s10 + $0x60] sm:$0xff]  ;;  %v1330_v53 = vld [vmem:[%s2863_s10 + $0x58] sm:$0xff]  ;;  %v1329_v54 = vld [vmem:[%s2863_s10 + $0x50] sm:$0xff] }
 0x38b   : > { %2204 = vmatpush3.msra.mxu0 %v1334_v26  ;;  %v1317_v52 = vld [vmem:[#allocation4 + $0x8] sm:$0xff]  ;;  %v1327_v56 = vld [vmem:[%s2863_s10 + $0x40] sm:$0xff]  ;;  %v1326_v57 = vld [vmem:[%s2863_s10 + $0x38] sm:$0xff] }
 0x38c   : > { %2205 = vmatprep.subr.mxu0 %v1333_v49  ;;  %2235 = vmatprep.mubr.f32.mxu0 %v1317_v52  ;;  %v1328_v55 = vld [vmem:[%s2863_s10 + $0x48] sm:$0xff]  ;;  %v1325_v58 = vld [vmem:[%s2863_s10 + $0x30] sm:$0xff]  ;;  %v1323_v60 = vld [vmem:[%s2863_s10 + $0x20] sm:$0xff] }
 0x38d   : > { %2206 = vmatpush3.msra.mxu0 %v1333_v49  ;;  %v1324_v59 = vld [vmem:[%s2863_s10 + $0x28] sm:$0xff]  ;;  %v1322_v61 = vld [vmem:[%s2863_s10 + $0x18] sm:$0xff]  ;;  %v1321_v62 = vld [vmem:[%s2863_s10 + $0x10] sm:$0xff] }
 0x38e   : > { %2207 = vmatprep.subr.mxu0 %v1332_v50  ;;  %v1320_v63 = vld [vmem:[%s2863_s10 + $0x8] sm:$0xff]  ;;  %v1319_v0 = vld [vmem:[%s2863_s10] sm:$0xff] }
 0x38f   : > { %2208 = vmatpush3.msra.mxu0 %v1332_v50  ;;  %v1318_v1 = vld [vmem:[#allocation4] sm:$0xff] }
 0x390   : > { %2209 = vmatprep.subr.mxu0 %v1331_v51  ;;  %v2046_v2 = vld [vmem:[%s2822_s20] ss:$0 sm:$0xff] }
 0x391   : > { %2210 = vmatpush3.msra.mxu0 %v1331_v51 }
 0x392   : > { %2211 = vmatprep.subr.mxu0 %v1330_v53 }
 0x393   : > { %2212 = vmatpush3.msra.mxu0 %v1330_v53 }
 0x394   : > { %2213 = vmatprep.subr.mxu0 %v1329_v54 }
 0x395   : > { %2214 = vmatpush3.msra.mxu0 %v1329_v54 }
 0x396   : > { %2215 = vmatprep.subr.mxu0 %v1328_v55 }
 0x397   : > { %2216 = vmatpush3.msra.mxu0 %v1328_v55 }
 0x398   : > { %2217 = vmatprep.subr.mxu0 %v1327_v56 }
 0x399   : > { %2218 = vmatpush3.msra.mxu0 %v1327_v56 }
 0x39a   : > { %2219 = vmatprep.subr.mxu0 %v1326_v57 }
 0x39b   : > { %2220 = vmatpush3.msra.mxu0 %v1326_v57 }
 0x39c   : > { %2221 = vmatprep.subr.mxu0 %v1325_v58 }
 0x39d   : > { %2222 = vmatpush3.msra.mxu0 %v1325_v58 }
 0x39e   : > { %2223 = vmatprep.subr.mxu0 %v1324_v59 }
 0x39f   : > { %2224 = vmatpush3.msra.mxu0 %v1324_v59 }
 0x3a0   : > { %2225 = vmatprep.subr.mxu0 %v1323_v60 }
 0x3a1   : > { %2226 = vmatpush3.msra.mxu0 %v1323_v60 }
 0x3a2   : > { %2227 = vmatprep.subr.mxu0 %v1322_v61 }
 0x3a3   : > { %2228 = vmatpush3.msra.mxu0 %v1322_v61 }
 0x3a4   : > { %2229 = vmatprep.subr.mxu0 %v1321_v62 }
 0x3a5   : > { %2230 = vmatpush3.msra.mxu0 %v1321_v62 }
 0x3a6   : > { %2231 = vmatprep.subr.mxu0 %v1320_v63 }
 0x3a7   : > { %2232 = vmatpush3.msra.mxu0 %v1320_v63 }
 0x3a8   : > { %2233 = vmatprep.subr.mxu0 %v1319_v0 }
 0x3a9   : > { %2234 = vmatpush3.msra.mxu0 %v1319_v0 }
 0x3aa   : > { %2236 = vmatmul.mubr.f32.vlgmr.msra.gmra.mxu0 %v1318_v1 }
 0x46a   : > { %v2237_v3 = vpop.f32.mrf.mxu0 }
 0x46b   : > { %v1414_v4 = vadd.f32 %v2237_v3, %v2046_v2 }
 0x46c   : > { %v1408_v5 = vpop.f32.mrf.mxu0 }
 0x46d   : > { %vm1418_vm9 = vcmp.ge.f32.partialorder %v1414_v4, 0.0  ;;  %v1420_v6 = vmul.f32 0.01, %v1414_v4  ;;  %v1409_v7 = vadd.f32 %v2046_v2, %v1408_v5 }
 0x46f   : > { %v1422_v8 = vsel %vm1418_vm9, %v1414_v4, %v1420_v6  ;;  %vm1417_vm10 = vcmp.ge.f32.partialorder %v1409_v7, 0.0  ;;  %v1419_v9 = vmul.f32 0.01, %v1409_v7 }
 0x470   : > { %1424 = vst [vmem:[#allocation2 + $0x8] sm:$0xff] %v1422_v8 }
 0x471   : > { %v1421_v10 = vsel %vm1417_vm10, %v1409_v7, %v1419_v9 }
 0x472   : > { %1423 = vst [vmem:[#allocation2] sm:$0xff] %v1421_v10 }
 0x473 PF: > { %p1425_p1 = scmp.eq.s32.totalorder %s2590_s25, 1 }
 0x475   : > { %p1426_p8 = pnand %p1425_p1, %p1313_p12 }
 0x476   : > { %s3243_s29 = sld [smem:[#allocation29_spill]] (!%p1426_p8) }
 0x477   : > { %1429 = sbr.rel (%p1426_p8) target bundleno = 1690 (0x69a), region = 108  ;;  %s3244_s7 = sld [smem:[#allocation26_spill]] (!%p1426_p8) }
 0x478   : > { %s3245_s19 = sld [smem:[#allocation27_spill]] (!%p1426_p8) }
 0x47c   : > { %v1451_v11 = vld [vmem:[#allocation8 + $0x78] sm:$0xff]  ;;  %v1450_v12 = vld [vmem:[#allocation8 + $0x70] sm:$0xff]  ;;  %v1449_v13 = vld [vmem:[#allocation8 + $0x68] sm:$0xff]  ;;  %vm1540_vm11 = vcmp.lt.s32.totalorder %v2929_v47, 16 }
 0x47d   : > { %2238 = vmatprep.subr.mxu0 %v1451_v11  ;;  %v1448_v14 = vld [vmem:[#allocation8 + $0x60] sm:$0xff]  ;;  %v1447_v17 = vld [vmem:[#allocation8 + $0x58] sm:$0xff]  ;;  %v1432_v18 = vld [vmem:[#allocation2] sm:$0xff] }
 0x47e   : > { %2239 = vmatpush3.msra.mxu0 %v1451_v11  ;;  %v1430_v15 = vld [vmem:[#allocation3 + $0x8] sm:$0xff]  ;;  %v1431_v16 = vld [vmem:[#allocation3] sm:$0xff]  ;;  %v1433_v19 = vld [vmem:[#allocation2 + $0x8] sm:$0xff] }
 0x47f   : > { %2240 = vmatprep.subr.mxu0 %v1450_v12  ;;  %v1434_v20 = vadd.f32 %v1432_v18, %v1430_v15  ;;  %v1435_v21 = vadd.f32 %v1433_v19, %v1431_v16  ;;  %v1446_v22 = vld [vmem:[#allocation8 + $0x50] sm:$0xff]  ;;  %v1445_v31 = vld [vmem:[#allocation8 + $0x48] sm:$0xff]  ;;  %v1444_v32 = vld [vmem:[#allocation8 + $0x40] sm:$0xff] }
 0x480   : > { %2241 = vmatpush3.msra.mxu0 %v1450_v12  ;;  %v1443_v29 = vld [vmem:[#allocation8 + $0x38] sm:$0xff]  ;;  %v1442_v30 = vld [vmem:[#allocation8 + $0x30] sm:$0xff]  ;;  %v1441_v35 = vld [vmem:[#allocation8 + $0x28] sm:$0xff] }
 0x481   : > { %2242 = vmatprep.subr.mxu0 %v1449_v13  ;;  %2270 = vmatprep.mubr.f32.mxu0 %v1434_v20  ;;  %v3026_v23 = vadd.f32 %v1435_v21, %v1434_v20  ;;  %v1440_v38 = vld [vmem:[#allocation8 + $0x20] sm:$0xff]  ;;  %v1439_v27 = vld [vmem:[#allocation8 + $0x18] sm:$0xff]  ;;  %v1438_v28 = vld [vmem:[#allocation8 + $0x10] sm:$0xff] }
 0x482   : > { %2243 = vmatpush3.msra.mxu0 %v1449_v13  ;;  %v1437_v34 = vld [vmem:[#allocation8 + $0x8] sm:$0xff]  ;;  %v1436_v37 = vld [vmem:[#allocation8] sm:$0xff]  ;;  %v1654_v46 = vld [vmem:[#allocation10 + $0xf8] sm:$0xff] }
 0x483   : > { %2244 = vmatprep.subr.mxu0 %v1448_v14  ;;  %v1622_v40 = vld [vmem:[%s3205_s12 + $0xf8] sm:$0xff]  ;;  %v1653_v24 = vld [vmem:[#allocation10 + $0xf0] sm:$0xff]  ;;  %1655 = vmatprep.subr.mxu1 %v1654_v46  ;;  %v1621_v25 = vld [vmem:[%s3205_s12 + $0xf0] sm:$0xff]  ;;  %v1584_v52 = vrot.slane %v3026_v23, 4 }
 0x484   : > { %2245 = vmatpush3.msra.mxu0 %v1448_v14  ;;  %v1652_v36 = vld [vmem:[#allocation10 + $0xe8] sm:$0xff]  ;;  %v1620_v39 = vld [vmem:[%s3205_s12 + $0xe8] sm:$0xff]  ;;  %1656 = vmatpush1.msra.mxu1 %v1653_v24  ;;  %v1651_v41 = vld [vmem:[#allocation10 + $0xe0] sm:$0xff] }
 0x485   : > { %2246 = vmatprep.subr.mxu0 %v1447_v17  ;;  %v1619_v42 = vld [vmem:[%s3205_s12 + $0xe0] sm:$0xff]  ;;  %v1650_v43 = vld [vmem:[#allocation10 + $0xd8] sm:$0xff]  ;;  %1657 = vmatprep.subr.mxu1 %v1652_v36  ;;  %v1618_v44 = vld [vmem:[%s3205_s12 + $0xd8] sm:$0xff]  ;;  %v1585_v61 = vadd.f32 %v1584_v52, %v3026_v23 }
 0x486   : > { %2247 = vmatpush3.msra.mxu0 %v1447_v17  ;;  %v1649_v45 = vld [vmem:[#allocation10 + $0xd0] sm:$0xff]  ;;  %v1617_v48 = vld [vmem:[%s3205_s12 + $0xd0] sm:$0xff]  ;;  %1658 = vmatpush1.msra.mxu1 %v1651_v41  ;;  %v1648_v26 = vld [vmem:[#allocation10 + $0xc8] sm:$0xff] }
 0x487   : > { %2248 = vmatprep.subr.mxu0 %v1446_v22  ;;  %v1616_v49 = vld [vmem:[%s3205_s12 + $0xc8] sm:$0xff]  ;;  %1659 = vmatprep.subr.mxu1 %v1650_v43  ;;  %v1647_v50 = vld [vmem:[#allocation10 + $0xc0] sm:$0xff]  ;;  %v1615_v51 = vld [vmem:[%s3205_s12 + $0xc0] sm:$0xff]  ;;  %v1586_v6 = vrot.slane %v1585_v61, 2 }
 0x488   : > { %2249 = vmatpush3.msra.mxu0 %v1446_v22  ;;  %1660 = vmatpush1.msra.mxu1 %v1649_v45  ;;  %v1646_v53 = vld [vmem:[#allocation10 + $0xb8] sm:$0xff]  ;;  %v1614_v54 = vld [vmem:[%s3205_s12 + $0xb8] sm:$0xff]  ;;  %v1645_v55 = vld [vmem:[#allocation10 + $0xb0] sm:$0xff] }
 0x489   : > { %2250 = vmatprep.subr.mxu0 %v1445_v31  ;;  %1661 = vmatprep.subr.mxu1 %v1648_v26  ;;  %v1613_v56 = vld [vmem:[%s3205_s12 + $0xb0] sm:$0xff]  ;;  %v1644_v57 = vld [vmem:[#allocation10 + $0xa8] sm:$0xff]  ;;  %v1612_v58 = vld [vmem:[%s3205_s12 + $0xa8] sm:$0xff]  ;;  %v1587_v15 = vadd.f32 %v1586_v6, %v1585_v61 }
 0x48a   : > { %2251 = vmatpush3.msra.mxu0 %v1445_v31  ;;  %1662 = vmatpush1.msra.mxu1 %v1647_v50  ;;  %v1643_v59 = vld [vmem:[#allocation10 + $0xa0] sm:$0xff]  ;;  %v1611_v60 = vld [vmem:[%s3205_s12 + $0xa0] sm:$0xff]  ;;  %v1642_v62 = vld [vmem:[#allocation10 + $0x98] sm:$0xff] }
 0x48b   : > { %2252 = vmatprep.subr.mxu0 %v1444_v32  ;;  %1663 = vmatprep.subr.mxu1 %v1646_v53  ;;  %v1610_v63 = vld [vmem:[%s3205_s12 + $0x98] sm:$0xff]  ;;  %v1641_v0 = vld [vmem:[#allocation10 + $0x90] sm:$0xff]  ;;  %v1609_v1 = vld [vmem:[%s3205_s12 + $0x90] sm:$0xff] }
 0x48c   : > { %2253 = vmatpush3.msra.mxu0 %v1444_v32  ;;  %1664 = vmatpush1.msra.mxu1 %v1645_v55  ;;  %v1640_v2 = vld [vmem:[#allocation10 + $0x88] sm:$0xff]  ;;  %v1608_v3 = vld [vmem:[%s3205_s12 + $0x88] sm:$0xff]  ;;  %v1639_v4 = vld [vmem:[#allocation10 + $0x80] sm:$0xff] }
 0x48d   : > { %2254 = vmatprep.subr.mxu0 %v1443_v29  ;;  %1665 = vmatprep.subr.mxu1 %v1644_v57  ;;  %v1607_v5 = vld [vmem:[%s3205_s12 + $0x80] sm:$0xff]  ;;  %v1638_v7 = vld [vmem:[#allocation10 + $0x78] sm:$0xff]  ;;  %v1606_v8 = vld [vmem:[%s3205_s12 + $0x78] sm:$0xff] }
 0x48e   : > { %2255 = vmatpush3.msra.mxu0 %v1443_v29  ;;  %1666 = vmatpush1.msra.mxu1 %v1643_v59  ;;  %v1637_v9 = vld [vmem:[#allocation10 + $0x70] sm:$0xff]  ;;  %v1605_v10 = vld [vmem:[%s3205_s12 + $0x70] sm:$0xff]  ;;  %v1636_v11 = vld [vmem:[#allocation10 + $0x68] sm:$0xff]  ;;  %v1588_v29 = vrot.slane %v1587_v15, 1 }
 0x48f   : > { %2256 = vmatprep.subr.mxu0 %v1442_v30  ;;  %1667 = vmatprep.subr.mxu1 %v1642_v62  ;;  %v1604_v12 = vld [vmem:[%s3205_s12 + $0x68] sm:$0xff]  ;;  %v1635_v13 = vld [vmem:[#allocation10 + $0x60] sm:$0xff]  ;;  %v1603_v14 = vld [vmem:[%s3205_s12 + $0x60] sm:$0xff] }
 0x490   : > { %2257 = vmatpush3.msra.mxu0 %v1442_v30  ;;  %1668 = vmatpush1.msra.mxu1 %v1641_v0  ;;  %v1634_v16 = vld [vmem:[#allocation10 + $0x58] sm:$0xff]  ;;  %v1602_v17 = vld [vmem:[%s3205_s12 + $0x58] sm:$0xff]  ;;  %v1633_v18 = vld [vmem:[#allocation10 + $0x50] sm:$0xff]  ;;  %v1805_v0 = vsub.s32 1, %v2990_v33 }
 0x491   : > { %2258 = vmatprep.subr.mxu0 %v1441_v35  ;;  %1669 = vmatprep.subr.mxu1 %v1640_v2  ;;  %v1601_v19 = vld [vmem:[%s3205_s12 + $0x50] sm:$0xff]  ;;  %v1632_v20 = vld [vmem:[#allocation10 + $0x48] sm:$0xff]  ;;  %v1629_v30 = vld [vmem:[#allocation10 + $0x30] sm:$0xff] }
 0x492   : > { %2259 = vmatpush3.msra.mxu0 %v1441_v35  ;;  %1670 = vmatpush1.msra.mxu1 %v1639_v4  ;;  %v1631_v22 = vld [vmem:[#allocation10 + $0x40] sm:$0xff]  ;;  %v1599_v23 = vld [vmem:[%s3205_s12 + $0x40] sm:$0xff]  ;;  %v1630_v31 = vld [vmem:[#allocation10 + $0x38] sm:$0xff] }
 0x493   : > { %2260 = vmatprep.subr.mxu0 %v1440_v38  ;;  %1671 = vmatprep.subr.mxu1 %v1638_v7  ;;  %v1598_v32 = vld [vmem:[%s3205_s12 + $0x38] sm:$0xff]  ;;  %v1597_v35 = vld [vmem:[%s3205_s12 + $0x30] sm:$0xff]  ;;  %v1625_v24 = vld [vmem:[#allocation10 + $0x10] sm:$0xff] }
 0x494   : > { %2261 = vmatpush3.msra.mxu0 %v1440_v38  ;;  %1672 = vmatpush1.msra.mxu1 %v1637_v9  ;;  %v1628_v38 = vld [vmem:[#allocation10 + $0x28] sm:$0xff]  ;;  %v1623_v41 = vld [vmem:[#allocation10] sm:$0xff] }
 0x495   : > { %2262 = vmatprep.subr.mxu0 %v1439_v27  ;;  %1673 = vmatprep.subr.mxu1 %v1636_v11  ;;  %v1594_v46 = vld [vmem:[%s3205_s12 + $0x18] sm:$0xff]  ;;  %v1797_v47 = vld [vmem:[%s3243_s29] sm:$0x3] }
 0x496   : > { %2263 = vmatpush3.msra.mxu0 %v1439_v27  ;;  %1674 = vmatpush1.msra.mxu1 %v1635_v13  ;;  %v1596_v27 = vld [vmem:[%s3205_s12 + $0x28] sm:$0xff]  ;;  %v1624_v36 = vld [vmem:[#allocation10 + $0x8] sm:$0xff]  ;;  %v1806_v6 = vrot.slane %v1797_v47, %v1805_v0 }
 0x497   : > { %2264 = vmatprep.subr.mxu0 %v1438_v28  ;;  %1675 = vmatprep.subr.mxu1 %v1634_v16  ;;  %v2048_v16 = vld [vmem:[%s3244_s7] ss:$0 sm:$0xff] }
 0x498   : > { %2265 = vmatpush3.msra.mxu0 %v1438_v28  ;;  %1676 = vmatpush1.msra.mxu1 %v1633_v18  ;;  %v1627_v28 = vld [vmem:[#allocation10 + $0x20] sm:$0xff]  ;;  %v2049_v18 = vld [vmem:[%s3245_s19] ss:$0 sm:$0xff] }
 0x499   : > { %2266 = vmatprep.subr.mxu0 %v1437_v34  ;;  %1677 = vmatprep.subr.mxu1 %v1632_v20 }
 0x49a   : > { %2267 = vmatpush3.msra.mxu0 %v1437_v34  ;;  %1678 = vmatpush1.msra.mxu1 %v1631_v22  ;;  %v1595_v34 = vld [vmem:[%s3205_s12 + $0x20] sm:$0xff] }
 0x49b   : > { %2268 = vmatprep.subr.mxu0 %v1436_v37  ;;  %1679 = vmatprep.subr.mxu1 %v1630_v31 }
 0x49c   : > { %2269 = vmatpush3.msra.mxu0 %v1436_v37  ;;  %1680 = vmatpush1.msra.mxu1 %v1629_v30  ;;  %v1626_v37 = vld [vmem:[#allocation10 + $0x18] sm:$0xff] }
 0x49d   : > { %2271 = vmatmul.mubr.f32.vlgmr.msra.gmra.mxu0 %v1435_v21  ;;  %1726 = vmatprep.subr.mxu0 %v1622_v40  ;;  %v1600_v21 = vld [vmem:[%s3205_s12 + $0x48] sm:$0xff]  ;;  %v1589_v40 = vadd.f32 %v1588_v29, %v1587_v15 }
 0x49e   : > { %1727 = vmatpush1.msra.mxu0 %v1621_v25  ;;  %1681 = vmatprep.subr.mxu1 %v1628_v38  ;;  %v1593_v25 = vld [vmem:[%s3205_s12 + $0x10] sm:$0xff] }
 0x49f   : > { %1728 = vmatprep.subr.mxu0 %v1620_v39  ;;  %1682 = vmatpush1.msra.mxu1 %v1627_v28  ;;  %v1592_v39 = vld [vmem:[%s3205_s12 + $0x8] sm:$0xff]  ;;  %v1590_v43 = vmul.f32 0.0625, %v1589_v40 }
 0x4a0   : > { %1729 = vmatpush1.msra.mxu0 %v1619_v42  ;;  %1683 = vmatprep.subr.mxu1 %v1626_v37  ;;  %v1591_v42 = vld [vmem:[%s3205_s12] sm:$0xff] }
 0x4a1   : > { %1730 = vmatprep.subr.mxu0 %v1618_v44  ;;  %1684 = vmatpush1.msra.mxu1 %v1625_v24  ;;  %v2615_v44 = vmov 0.0  }
 0x4a2   : > { %1731 = vmatpush1.msra.mxu0 %v1617_v48  ;;  %1685 = vmatprep.subr.mxu1 %v1624_v36  ;;  %v2047_v48 = vld [vmem:[%s3202_s9] ss:$0 sm:$0xff] }
 0x4a3   : > { %1732 = vmatprep.subr.mxu0 %v1616_v49  ;;  %1686 = vmatpush1.msra.mxu1 %v1623_v41 }
 0x4a4   : > { %1733 = vmatpush1.msra.mxu0 %v1615_v51  ;;  %1719 = vmatprep.mubr.f32.mxu1 %v2615_v44 }
 0x4a5   : > { %1734 = vmatprep.subr.mxu0 %v1614_v54  ;;  %1790 = vmatprep.mubr.f32.mxu0 %v2615_v44 }
 0x4a6   : > { %1735 = vmatpush1.msra.mxu0 %v1613_v56  ;;  %1720 = vmatmul.mubr.f32.vlgmr.msra.gmra.mxu1 %v1590_v43 }
 0x4a7   : > { %1736 = vmatprep.subr.mxu0 %v1612_v58 }
 0x4a8   : > { %1737 = vmatpush1.msra.mxu0 %v1611_v60 }
 0x4a9   : > { %1738 = vmatprep.subr.mxu0 %v1610_v63  ;;  %v1801_v63 = vsub.s32 0, %v2990_v33 }
 0x4aa   : > { %1739 = vmatpush1.msra.mxu0 %v1609_v1 }
 0x4ab   : > { %1740 = vmatprep.subr.mxu0 %v1608_v3  ;;  %v1802_v4 = vrot.slane %v1797_v47, %v1801_v63 }
 0x4ac   : > { %1741 = vmatpush1.msra.mxu0 %v1607_v5 }
 0x4ad   : > { %1742 = vmatprep.subr.mxu0 %v1606_v8 }
 0x4ae   : > { %1743 = vmatpush1.msra.mxu0 %v1605_v10 }
 0x4af   : > { %1744 = vmatprep.subr.mxu0 %v1604_v12 }
 0x4b0   : > { %1745 = vmatpush1.msra.mxu0 %v1603_v14 }
 0x4b1   : > { %1746 = vmatprep.subr.mxu0 %v1602_v17 }
 0x4b2   : > { %1747 = vmatpush1.msra.mxu0 %v1601_v19 }
 0x4b3   : > { %1748 = vmatprep.subr.mxu0 %v1600_v21 }
 0x4b4   : > { %1749 = vmatpush1.msra.mxu0 %v1599_v23 }
 0x4b5   : > { %1750 = vmatprep.subr.mxu0 %v1598_v32 }
 0x4b6   : > { %1751 = vmatpush1.msra.mxu0 %v1597_v35 }
 0x4b7   : > { %1752 = vmatprep.subr.mxu0 %v1596_v27 }
 0x4b8   : > { %1753 = vmatpush1.msra.mxu0 %v1595_v34 }
 0x4b9   : > { %1754 = vmatprep.subr.mxu0 %v1594_v46 }
 0x4ba   : > { %1755 = vmatpush1.msra.mxu0 %v1593_v25 }
 0x4bb   : > { %1756 = vmatprep.subr.mxu0 %v1592_v39 }
 0x4bc   : > { %1757 = vmatpush1.msra.mxu0 %v1591_v42 }
 0x4bd   : > { %1791 = vmatmul.mubr.f32.vlgmr.msra.gmra.mxu0 %v1589_v40 }
 0x55d   : > { %v2272_v45 = vpop.f32.mrf.mxu0 }
 0x55e   : > { %v1531_v50 = vadd.f32 %v2272_v45, %v2047_v48 }
 0x55f   : > { %v1525_v26 = vpop.f32.mrf.mxu0 }
 0x560   : > { %v1526_v49 = vadd.f32 %v2047_v48, %v1525_v26 }
 0x562   : > { %1534 = vadd.xlane.f32.xlu0 %v1526_v49 }
 0x566   : > { %1536 = vadd.xlane.f32.xlu0 %v1531_v50  ;;  %v1721_v61 = vpop.f32.mrf.mxu1 }
 0x568   : > { %v1723_v1 = vpop.f32.mrf.mxu1 }
 0x57d   : > { %v1792_v62 = vpop.f32.mrf.mxu0 }
 0x57e   : > { %v1793_v3 = vadd.f32 %v1792_v62, %v1721_v61 }
 0x57f   : > { %v1794_v2 = vpop.f32.mrf.mxu0 }
 0x580   : > { %v1795_v5 = vadd.f32 %v1794_v2, %v1723_v1  ;;  %v1809_v7 = vadd.f32 %v1802_v4, %v1793_v3 }
 0x582   : > { %v1810_v8 = vadd.f32 %v1806_v6, %v1795_v5 }
 0x584   : > { %v1811_v9 = vmul.f32 %v1810_v8, %v1809_v7 }
 0x586   : > { %1812 = vst [vmem:[#allocation12] sm:$0x1] %v1811_v9 }
 0x5eb   : > { %v1535_v51 = vpop.xlane.xlu0 %1534 }
 0x5ec   : > { %v1538_v52 = vmul.f32 0.0625, %v1535_v51 }
 0x5ee   : > { %v1541_v53 = vsub.f32 %v1526_v49, %v1538_v52 }
 0x5ef   : > { %v1537_v54 = vpop.xlane.xlu0 %1536 }
 0x5f0   : > { %v1539_v55 = vmul.f32 0.0625, %v1537_v54  ;;  %v1543_v56 = vsel %vm1540_vm11, %v1541_v53, 0.0 }
 0x5f1   : > { %v1545_v57 = vmul.f32 %v1543_v56, %v1543_v56 }
 0x5f2   : > { %v1542_v58 = vsub.f32 %v1531_v50, %v1539_v55 }
 0x5f3   : > { %1547 = vadd.xlane.f32.xlu1 %v1545_v57 }
 0x5f4   : > { %v1544_v59 = vsel %vm1540_vm11, %v1542_v58, 0.0 }
 0x5f5   : > { %v1546_v60 = vmul.f32 %v1544_v59, %v1544_v59 }
 0x5f7   : > { %1549 = vadd.xlane.f32.xlu1 %v1546_v60 }
 0x67c   : > { %v1548_v10 = vpop.xlane.xlu1 %1547 }
 0x67d   : > { %v1551_v11 = vmul.f32 0.0625, %v1548_v10 }
 0x67f   : > { %v1553_v12 = vadd.f32 1e-05, %v1551_v11 }
 0x680   : > { %v1550_v13 = vpop.xlane.xlu1 %1549 }
 0x681   : > { %2392 = vrsqrt.f32 %v1553_v12  ;;  %v1552_v33 = vmul.f32 0.0625, %v1550_v13 }
 0x683   : > { %v1554_v14 = vadd.f32 1e-05, %v1552_v33 }
 0x685   : > { %2394 = vrsqrt.f32 %v1554_v14 }
 0x68e   : > { %v2393_v15 = vpop.eup %2392 }
 0x68f   : > { %v1557_v17 = vmul.f32 %v2393_v15, %v1543_v56 }
 0x691   : > { %v1566_v19 = vmul.f32 %v2048_v16, %v1557_v17 }
 0x692   : > { %v2395_v20 = vpop.eup %2394 }
 0x693   : > { %v1575_v21 = vadd.f32 %v2049_v18, %v1566_v19  ;;  %v1558_v22 = vmul.f32 %v2395_v20, %v1544_v59 }
 0x695   : > { %1577 = vst [vmem:[#allocation11] sm:$0xff] %v1575_v21  ;;  %v1567_v23 = vmul.f32 %v2048_v16, %v1558_v22 }
 0x697   : > { %v1576_v31 = vadd.f32 %v2049_v18, %v1567_v23 }
 0x699   : > { %1578 = vst [vmem:[#allocation11 + $0x8] sm:$0xff] %v1576_v31 }
 0x69a PF: > { %s3246_s15 = sld [smem:[#allocation19_spill]]  ;;  %s2616_s20 = smov [#allocation11]  }
 0x69b   : > { %s1819_s14 = sshll.u32 %s2616_s20, 4  ;;  %s1820_s14 = int_to_ptr.vmem [resolvable:$true] %s1819_s14 }
 0x69c   : > { %s2476_s21 = scalar_lea.vmem %s1820_s14, 256  ;;  %p2483_p3 = scmp.lt.s32.totalorder %s1820_s14, %s1820_s14 }
 0x69d   : > { %p2477_p0 = scmp.ne.s32.totalorder %s1820_s14, %s2476_s21  ;;  %p2484_p7 = scmp.lt.s32.totalorder %s2476_s21, %s2476_s21 }
 0x69f   : > { %p2485_p4 = por %p2484_p7, %p2483_p3 }
 0x6a0   : > { %s3247_s24 = sadd.s32 4294967295, %s3246_s15  }
 0x6a1   : > { %p3143_p13 = scmp.eq.s32.totalorder %s3247_s24, 3 }
 0x6a3   : > { %p2478_p2 = pnand %p2477_p0, %p3143_p13 }
 0x6a5   : > { %p2479_p5 = pneg %p2478_p2 }
 0x6a7   : > { %p2486_p6 = pnand %p2485_p4, %p2479_p5 }
 0x6a9   : > { %2489 = shalt.err (!%p2486_p6)
}
 0x6aa   : > { %s2617_s28 = smov 128   ;;  %s2618_s0 = smov 8  }
 0x6ab   : > { %s3249_s16 = sld [smem:[#allocation30_spill]]  ;;  %s2619_s17 = smov [#allocation12]  }
 0x6ac   : > { %s1833_s29 = sshll.u32 %s2619_s17, 4  ;;  %s1834_s29 = int_to_ptr.vmem [resolvable:$true] %s1833_s29 }
 0x6ad   : > { %s2500_s11 = scalar_lea.vmem %s1834_s29, 16  ;;  %s2506_s8 = scalar_lea.vmem %s1834_s29, 32 }
 0x6ae   : > { %p2501_p9 = scmp.ne.s32.totalorder %s1834_s29, %s2500_s11  ;;  %p2507_p11 = scmp.lt.s32.totalorder %s1834_s29, %s1834_s29 }
 0x6af   : > { %p2508_p1 = scmp.lt.s32.totalorder %s2506_s8, %s2500_s11 }
 0x6b0   : > { %p2502_p10 = pnand %p2501_p9, %p3143_p13 }
 0x6b1   : > { %2284 = dma.vmem_to_hbm [thread:$0]  (%p3143_p13), %s1820_s14, 256, %s3249_s16, [#allocation7], %s2617_s28, %s2617_s28, %s2618_s0  }
 0x6b2   : > { %p2503_p12 = pneg %p2502_p10  ;;  %p2509_p8 = por %p2508_p1, %p2507_p11 }
 0x6b4   : > { %p2510_p0 = pnand %p2509_p8, %p2503_p12 }
 0x6b6   : > { %2513 = shalt.err (!%p2510_p0)
}
 0x6b7   : > { %s3250_s1 = sld [smem:[#allocation31_spill]] }
 0x6bd   : > { %2286 = dma.vmem_to_hbm [thread:$0]  (%p3143_p13), %s1834_s29, 16, %s3250_s1, [#allocation13]  }
 0x6be   : > { %2565 = dma.done.wait (%p3143_p13), [#allocation7], 256  }
 0x6bf   : > { %2567 = vsyncadd (%p3143_p13), [#allocation7], 4294967040 }
 0x6c0   : > { %2569 = dma.done.wait (%p3143_p13), [#allocation13], 16  }
 0x6c1   : > { %2571 = vsyncadd (%p3143_p13), [#allocation13], 4294967280 }
 0x6c2 PF: > { %s3251_s19 = sld [smem:[#allocation19_spill]]  ;;  %s3255_s21 = smov %s2578_s22 }
 0x6c3   : > { %s3252_s24 = sld [smem:[#allocation18_spill]]  ;;  %s3256_s22 = smov %s2582_s23 }
 0x6c4   : > { %s3253_s15 = sld [smem:[#allocation20_spill]]  ;;  %s3257_s23 = smov %s2813_s26 }
 0x6c5   : > { %s3254_s20 = sld [smem:[#allocation21_spill]]  ;;  %s3258_s25 = smov %s2598_s27 }
 0x6c8   : > { %s33_s28 = sadd.s32 1, %s3251_s19  }
 0x6c9   : > { %p30_p2 = scmp.ge.s32.totalorder %s33_s28, 6  }
 0x6ca   : > { %s3259_s26 = smov %s3253_s15 }
 0x6cb   : > { %s3260_s27 = smov %s3254_s20  ;;  %32 = sbr.rel (!%p30_p2) target bundleno = 19 (0x13), region = 164 }
 0x6d0   :  { %1850 = vsyncpa [#allocation6], 1 }
 0x6d1   :  { %1852 = vsyncpa [#allocation6 + $0x1], 1 }
 0x6d2   :  { %1853 = vsyncpa [#allocation9], 1 }
 0x6d3   :  { %1854 = vsyncpa [#allocation7], 1 }
 0x6d4   :  { %1856 = vsyncpa [#allocation7 + $0x1], 1 }
 0x6d5   :  { %1857 = vsyncpa [#allocation13], 1 }

</bundles_post_ra>
